<compile_context>
chip_gen: v7x
topology: tpu7x:2x2x1
jax: 0.10.0
libtpu: 0.0.40
codegen_flags: <defaults>
</compile_context>

<pallas_src>
import math
import functools

import jax
import jax.numpy as jnp
from jax.experimental import pallas as pl
from jax.experimental.pallas import tpu as pltpu

_INV_SQRT2 = 1.0 / math.sqrt(2.0)


def _round_up(x, m):
    return (x + m - 1) // m * m


def _gelu_exact(h):
    # torch.nn.GELU() default = exact erf form:
    #   gelu(z) = 0.5 * z * (1 + erf(z / sqrt(2)))
    return 0.5 * h * (1.0 + jax.scipy.special.erf(h * _INV_SQRT2))


# ----------------------------------------------------------------------------
# Kernels: one (row-tile i, hidden-tile j) step of
#   out[i] = sum_j gelu(x[i] @ W1[:, j] + b1[j]) @ W2[j, :]  + b2
# ----------------------------------------------------------------------------
def _mlp_kernel_inplace(x_ref, w1_ref, b1_ref, w2_ref, b2_ref, o_ref):
    """f32 output: accumulate directly into the resident output block."""
    j = pl.program_id(1)

    @pl.when(j == 0)
    def _init():
        o_ref[...] = jnp.zeros_like(o_ref)

    # c_fc slice: (TM, TH), f32 accumulation on the MXU, bias in f32.
    h = jnp.dot(x_ref[...], w1_ref[...],
                preferred_element_type=jnp.float32) + b1_ref[...]
    h = _gelu_exact(h)

    # c_proj partial product, accumulated over hidden tiles in f32.
    o_ref[...] += jnp.dot(h.astype(w2_ref.dtype), w2_ref[...],
                          preferred_element_type=jnp.float32)

    @pl.when(j == pl.num_programs(1) - 1)
    def _finalize():
        # dropout(p) in eval mode == identity
        o_ref[...] = o_ref[...] + b2_ref[...]


def _mlp_kernel_scratch(x_ref, w1_ref, b1_ref, w2_ref, b2_ref, o_ref, acc_ref):
    """Non-f32 output: f32 scratch accumulator, cast on the final hidden step."""
    j = pl.program_id(1)

    @pl.when(j == 0)
    def _init():
        acc_ref[...] = jnp.zeros_like(acc_ref)

    h = jnp.dot(x_ref[...], w1_ref[...],
                preferred_element_type=jnp.float32) + b1_ref[...]
    h = _gelu_exact(h)
    acc_ref[...] += jnp.dot(h.astype(w2_ref.dtype), w2_ref[...],
                            preferred_element_type=jnp.float32)

    @pl.when(j == pl.num_programs(1) - 1)
    def _finalize():
        o_ref[...] = (acc_ref[...] + b2_ref[...]).astype(o_ref.dtype)


# ----------------------------------------------------------------------------
# Generation-aware sizing helpers (trace-time Python; safe under jit).
# ----------------------------------------------------------------------------
def _tpu_generation_info():
    vmem_cap = 128 << 20
    kind = ""
    try:
        vmem_cap = int(pltpu.get_tpu_info().vmem_capacity_bytes)
    except Exception:
        pass
    try:
        kind = jax.devices()[0].device_kind.lower()
    except Exception:
        pass
    multi_core = any(g in kind for g in ("v4", "v5p", "v7"))
    return vmem_cap, kind, multi_core


def _default_tile_m(vmem_cap, kind):
    # Arithmetic intensity of the hidden loop ~= TM FLOP/byte.
    if "v7" in kind or vmem_cap <= (64 << 20):
        return 512           # 3.2 TB/s HBM -> ~310 breakeven; leave VMEM slack
    if "v6" in kind:
        return 768           # 918 TF/s vs ~1.4 TB/s -> ~640 breakeven
    if "v5" in kind:
        return 384           # ~240 breakeven, 4x128 MXU (128-multiples fine)
    return 512


def _vmem_need(tm, th, C, cbytes, obytes, use_scratch):
    need = (
        2 * tm * C * cbytes          # x tile (double-buffered)
        + 2 * C * th * cbytes        # W1 tile
        + 2 * th * C * cbytes        # W2 tile
        + 2 * 8 * th * 4             # b1 tile (sublane-padded)
        + 2 * 8 * C * 4              # b2
        + 2 * tm * C * obytes        # out tile
    )
    if use_scratch:
        need += tm * C * 4           # f32 accumulator scratch
    return need


def _divisor_tile_h(H, cap):
    """Largest multiple of 128 that divides H and is <= cap (H % 128 == 0)."""
    cap = max(128, min(cap, H))
    best = 128
    t = 128
    while t <= cap:
        if H % t == 0:
            best = t
        t += 128
    return best


# ----------------------------------------------------------------------------
# Wrapper: reshape / pad glue + pallas_call with (row, hidden) tiling.
# ----------------------------------------------------------------------------
@functools.partial(jax.jit, static_argnames=("tile_m", "tile_h", "compute_dtype"))
def mlp_forward(x, w1, b1, w2, b2, *, tile_m=None, tile_h=512,
                compute_dtype=jnp.bfloat16):
    """x: (B, T, C); w1: (C, H); b1: (H,); w2: (H, C); b2: (C,)."""
    B, T, C = x.shape
    H = w1.shape[1]
    assert C % 128 == 0, "n_embd must be a multiple of 128 (lane width)"
    assert H % 128 == 0, "hidden dim must be a multiple of 128 (lane width)"

    M = B * T
    out_dtype = x.dtype
    use_scratch = out_dtype != jnp.float32   # f32 outputs accumulate in-place

    vmem_cap, kind, multi_core = _tpu_generation_info()
    budget = max(vmem_cap - (16 << 20), 32 << 20)   # headroom for compiler scratch

    if tile_m is None:
        tile_m = _default_tile_m(vmem_cap, kind)

    cbytes = jnp.dtype(compute_dtype).itemsize
    obytes = jnp.dtype(out_dtype).itemsize

    # Row tile: multiple of 128 by default, clamped to padded M (16 = bf16
    # sublane packing) for small inputs.
    tile_m_eff = min(_round_up(tile_m, 128), _round_up(M, 16))

    def fits(tm, th):
        return _vmem_need(tm, th, C, cbytes, obytes, use_scratch) <= budget

    # Weights-resident fast path: W1/W2 DMA'd once for the whole call.
    if fits(tile_m_eff, H):
        tile_h_eff = H
    else:
        tile_h_eff = _divisor_tile_h(H, tile_h)
        while not fits(tile_m_eff, tile_h_eff):
            if tile_h_eff > 128:
                tile_h_eff = _divisor_tile_h(H, tile_h_eff // 2)
            elif tile_m_eff > 128:
                tile_m_eff = max(128, _round_up(tile_m_eff // 2, 128))
            else:
                break

    # Dual-TensorCore chips: make sure the "parallel" row axis has >= 2 tiles.
    if multi_core and _round_up(M, tile_m_eff) // tile_m_eff == 1 and M >= 256:
        tile_m_eff = min(tile_m_eff, _round_up(-(-M // 2), 128))

    M_pad = _round_up(M, tile_m_eff)

    x2 = x.reshape(M, C)
    if M_pad != M:
        x2 = jnp.pad(x2, ((0, M_pad - M), (0, 0)))
    x2 = x2.astype(compute_dtype)
    # Only cast weights if the caller didn't already provide compute_dtype
    # weights (prepare_weights caches that cast once; astype is then a no-op).
    w1c = w1 if w1.dtype == compute_dtype else w1.astype(compute_dtype)
    w2c = w2 if w2.dtype == compute_dtype else w2.astype(compute_dtype)
    b1_2 = b1.reshape(1, H).astype(jnp.float32)
    b2_2 = b2.reshape(1, C).astype(jnp.float32)

    grid = (M_pad // tile_m_eff, H // tile_h_eff)

    vmem_need = _vmem_need(tile_m_eff, tile_h_eff, C, cbytes, obytes, use_scratch)
    vmem_limit = int(min(int(vmem_need * 1.25) + (4 << 20), budget))

    kernel = _mlp_kernel_scratch if use_scratch else _mlp_kernel_inplace
    scratch_shapes = ([pltpu.VMEM((tile_m_eff, C), jnp.float32)]
                      if use_scratch else [])

    out2 = pl.pallas_call(
        kernel,
        out_shape=jax.ShapeDtypeStruct((M_pad, C), out_dtype),
        grid_spec=pltpu.PrefetchScalarGridSpec(
            num_scalar_prefetch=0,
            grid=grid,
            in_specs=[
                pl.BlockSpec((tile_m_eff, C), lambda i, j: (i, 0)),   # x row tile
                pl.BlockSpec((C, tile_h_eff), lambda i, j: (0, j)),   # W1 col tile
                pl.BlockSpec((1, tile_h_eff), lambda i, j: (0, j)),   # b1 tile
                pl.BlockSpec((tile_h_eff, C), lambda i, j: (j, 0)),   # W2 row tile
                pl.BlockSpec((1, C),          lambda i, j: (0, 0)),   # b2
            ],
            out_specs=pl.BlockSpec((tile_m_eff, C), lambda i, j: (i, 0)),
            scratch_shapes=scratch_shapes,
        ),
        compiler_params=pltpu.CompilerParams(
            dimension_semantics=("parallel", "arbitrary"),
            vmem_limit_bytes=vmem_limit,
        ),
    )(x2, w1c, b1_2, w2c, b2_2)

    if M_pad != M:
        out2 = out2[:M]
    return out2.reshape(B, T, C)


# ----------------------------------------------------------------------------
# Parameter init (PyTorch nn.Linear default: U(-k, k), k=1/sqrt(fan_in)) and a
# one-time weight cast so the per-call path never re-streams f32 weights.
# ----------------------------------------------------------------------------
def init_params(key, n_embd):
    hidden = 4 * n_embd
    k1, k2, k3, k4 = jax.random.split(key, 4)

    bound_fc = 1.0 / math.sqrt(n_embd)
    bound_proj = 1.0 / math.sqrt(hidden)

    # Stored already transposed to (in_features, out_features).
    w1 = jax.random.uniform(k1, (n_embd, hidden), jnp.float32,
                            minval=-bound_fc, maxval=bound_fc)
    b1 = jax.random.uniform(k2, (hidden,), jnp.float32,
                            minval=-bound_fc, maxval=bound_fc)
    w2 = jax.random.uniform(k3, (hidden, n_embd), jnp.float32,
                            minval=-bound_proj, maxval=bound_proj)
    b2 = jax.random.uniform(k4, (n_embd,), jnp.float32,
                            minval=-bound_proj, maxval=bound_proj)
    return w1, b1, w2, b2


def prepare_weights(w1, w2, compute_dtype=jnp.bfloat16):
    """One-time cast of the weight matrices to the MXU compute dtype."""
    return w1.astype(compute_dtype), w2.astype(compute_dtype)


def reference_mlp(x, w1, b1, w2, b2):
    """Pure-JAX f32 reference (exact-erf GELU, eval-mode dropout)."""
    h = x @ w1 + b1
    h = 0.5 * h * (1.0 + jax.scipy.special.erf(h / math.sqrt(2.0)))
    return h @ w2 + b2


if __name__ == "__main__":
    # GPTConfig-consistent small demo: n_embd=256 -> hidden=1024, batch=2, seq=8.
    B, T, C = 2, 8, 256

    key = jax.random.PRNGKey(0)
    kx, kp = jax.random.split(key)

    x = jax.random.normal(kx, (B, T, C), dtype=jnp.float32)
    w1, b1, w2, b2 = init_params(kp, C)
    w1c, w2c = prepare_weights(w1, w2)          # cached bf16 cast (once, not per call)

    out = jax.block_until_ready(mlp_forward(x, w1c, b1, w2c, b2))
    ref = reference_mlp(x, w1, b1, w2, b2)
    assert out.shape == (B, T, C), out.shape
    # bf16 MXU inputs with f32 accumulation: ~1e-2-level tolerance vs f32 ref.
    assert jnp.allclose(out, ref, atol=2e-2, rtol=2e-2), (
        float(jnp.max(jnp.abs(out - ref))))

    # Ragged rows (B*T not a multiple of the row tile) exercises pad/slice path.
    x_r = jax.random.normal(jax.random.PRNGKey(1), (3, 5, C), dtype=jnp.float32)
    out_r = jax.block_until_ready(mlp_forward(x_r, w1c, b1, w2c, b2))
    ref_r = reference_mlp(x_r, w1, b1, w2, b2)
    assert out_r.shape == (3, 5, C), out_r.shape
    assert jnp.allclose(out_r, ref_r, atol=2e-2, rtol=2e-2), (
        float(jnp.max(jnp.abs(out_r - ref_r))))

    print("KERNEL_OK")
</pallas_src>

<mosaic_0001>
module attributes {stable_mosaic.version = 11 : i64} {
  func.func @_mlp_kernel_inplace(%arg0: i32, %arg1: i32, %arg2: memref<16x256xbf16, #tpu.memory_space<vmem>>, %arg3: memref<256x1024xbf16, #tpu.memory_space<vmem>>, %arg4: memref<1x1024xf32, #tpu.memory_space<vmem>>, %arg5: memref<1024x256xbf16, #tpu.memory_space<vmem>>, %arg6: memref<1x256xf32, #tpu.memory_space<vmem>>, %arg7: memref<16x256xf32, #tpu.memory_space<vmem>>) attributes {dimension_semantics = [#tpu.dimension_semantics<parallel>, #tpu.dimension_semantics<arbitrary>], iteration_bounds = array<i64: 1, 1>, scalar_prefetch = 0 : i64, scratch_operands = 0 : i64, tpu.core_type = #tpu.core_type<tc>, window_params = [{transform_indices = @transform_0, window_bounds = array<i64: 16, 256>}, {transform_indices = @transform_1, window_bounds = array<i64: 256, 1024>}, {transform_indices = @transform_2, window_bounds = array<i64: 1, 1024>}, {transform_indices = @transform_3, window_bounds = array<i64: 1024, 256>}, {pipeline_mode = #tpu.pipeline_mode<synchronous>, transform_indices = @transform_4, window_bounds = array<i64: 1, 256>}, {transform_indices = @transform_5, window_bounds = array<i64: 16, 256>}]} {
    %c0_i32 = arith.constant 0 : i32
    %0 = arith.cmpi eq, %arg1, %c0_i32 : i32
    %1 = arith.extui %0 : i1 to i32
    %c0_i32_0 = arith.constant 0 : i32
    %2 = arith.cmpi ne, %1, %c0_i32_0 : i32
    scf.if %2 {
      %cst_18 = arith.constant 0.000000e+00 : f32
      %26 = vector.broadcast %cst_18 : f32 to vector<16x256xf32>
      %c0_19 = arith.constant 0 : index
      %c0_20 = arith.constant 0 : index
      %27 = vector.load %arg7[%c0_19, %c0_20] : memref<16x256xf32, #tpu.memory_space<vmem>>, vector<16x256xf32>
      tpu.vector_store %arg7[%c0_19, %c0_20], %26 {strides = array<i32>} : memref<16x256xf32, #tpu.memory_space<vmem>>, vector<16x256xf32>,
    } else {
    }
    %c0 = arith.constant 0 : index
    %c0_1 = arith.constant 0 : index
    %3 = vector.load %arg2[%c0, %c0_1] : memref<16x256xbf16, #tpu.memory_space<vmem>>, vector<16x256xbf16>
    %c0_2 = arith.constant 0 : index
    %c0_3 = arith.constant 0 : index
    %4 = vector.load %arg3[%c0_2, %c0_3] : memref<256x1024xbf16, #tpu.memory_space<vmem>>, vector<256x1024xbf16>
    %cst = arith.constant dense<0.000000e+00> : vector<16x1024xf32>
    %5 = tpu.matmul %3, %4, %cst {dimension_numbers = #tpu.dot_dimension_numbers<[1], [0], [0], [1], [0, 0, 1, 1], [], []>} : vector<16x256xbf16>, vector<256x1024xbf16>, vector<16x1024xf32> -> vector<16x1024xf32>
    %c0_4 = arith.constant 0 : index
    %c0_5 = arith.constant 0 : index
    %6 = vector.load %arg4[%c0_4, %c0_5] : memref<1x1024xf32, #tpu.memory_space<vmem>>, vector<1x1024xf32>
    %7 = vector.broadcast %6 : vector<1x1024xf32> to vector<16x1024xf32>
    %8 = arith.addf %5, %7 : vector<16x1024xf32>
    %cst_6 = arith.constant 5.000000e-01 : f32
    %9 = vector.broadcast %cst_6 : f32 to vector<16x1024xf32>
    %10 = arith.mulf %9, %8 : vector<16x1024xf32>
    %cst_7 = arith.constant 0.707106769 : f32
    %11 = vector.broadcast %cst_7 : f32 to vector<16x1024xf32>
    %12 = arith.mulf %8, %11 : vector<16x1024xf32>
    %13 = math.erf %12 : vector<16x1024xf32>
    %cst_8 = arith.constant 1.000000e+00 : f32
    %14 = vector.broadcast %cst_8 : f32 to vector<16x1024xf32>
    %15 = arith.addf %14, %13 : vector<16x1024xf32>
    %16 = arith.mulf %10, %15 : vector<16x1024xf32>
    %c0_9 = arith.constant 0 : index
    %c0_10 = arith.constant 0 : index
    %17 = vector.load %arg7[%c0_9, %c0_10] : memref<16x256xf32, #tpu.memory_space<vmem>>, vector<16x256xf32>
    %18 = arith.truncf %16 : vector<16x1024xf32> to vector<16x1024xbf16>
    %c0_11 = arith.constant 0 : index
    %c0_12 = arith.constant 0 : index
    %19 = vector.load %arg5[%c0_11, %c0_12] : memref<1024x256xbf16, #tpu.memory_space<vmem>>, vector<1024x256xbf16>
    %cst_13 = arith.constant dense<0.000000e+00> : vector<16x256xf32>
    %20 = tpu.matmul %18, %19, %cst_13 {dimension_numbers = #tpu.dot_dimension_numbers<[1], [0], [0], [1], [0, 0, 1, 1], [], []>} : vector<16x1024xbf16>, vector<1024x256xbf16>, vector<16x256xf32> -> vector<16x256xf32>
    %21 = arith.addf %17, %20 : vector<16x256xf32>
    %c0_14 = arith.constant 0 : index
    %c0_15 = arith.constant 0 : index
    %22 = vector.load %arg7[%c0_14, %c0_15] : memref<16x256xf32, #tpu.memory_space<vmem>>, vector<16x256xf32>
    tpu.vector_store %arg7[%c0_14, %c0_15], %21 {strides = array<i32>} : memref<16x256xf32, #tpu.memory_space<vmem>>, vector<16x256xf32>,
    %c0_i32_16 = arith.constant 0 : i32
    %23 = arith.cmpi eq, %arg1, %c0_i32_16 : i32
    %24 = arith.extui %23 : i1 to i32
    %c0_i32_17 = arith.constant 0 : i32
    %25 = arith.cmpi ne, %24, %c0_i32_17 : i32
    scf.if %25 {
      %c0_18 = arith.constant 0 : index
      %c0_19 = arith.constant 0 : index
      %26 = vector.load %arg7[%c0_18, %c0_19] : memref<16x256xf32, #tpu.memory_space<vmem>>, vector<16x256xf32>
      %c0_20 = arith.constant 0 : index
      %c0_21 = arith.constant 0 : index
      %27 = vector.load %arg6[%c0_20, %c0_21] : memref<1x256xf32, #tpu.memory_space<vmem>>, vector<1x256xf32>
      %28 = vector.broadcast %27 : vector<1x256xf32> to vector<16x256xf32>
      %29 = arith.addf %26, %28 : vector<16x256xf32>
      %c0_22 = arith.constant 0 : index
      %c0_23 = arith.constant 0 : index
      %30 = vector.load %arg7[%c0_22, %c0_23] : memref<16x256xf32, #tpu.memory_space<vmem>>, vector<16x256xf32>
      tpu.vector_store %arg7[%c0_22, %c0_23], %29 {strides = array<i32>} : memref<16x256xf32, #tpu.memory_space<vmem>>, vector<16x256xf32>,
    } else {
    }
    return
  }
  func.func @transform_0(%arg0: i32, %arg1: i32) -> (i32, i32) {
    %c0_i32 = arith.constant 0 : i32
    %c0_i32_0 = arith.constant 0 : i32
    return %arg0, %c0_i32 : i32, i32
  }
  func.func @transform_1(%arg0: i32, %arg1: i32) -> (i32, i32) {
    %c0_i32 = arith.constant 0 : i32
    %c0_i32_0 = arith.constant 0 : i32
    return %c0_i32, %arg1 : i32, i32
  }
  func.func @transform_2(%arg0: i32, %arg1: i32) -> (i32, i32) {
    %c0_i32 = arith.constant 0 : i32
    %c0_i32_0 = arith.constant 0 : i32
    return %c0_i32, %arg1 : i32, i32
  }
  func.func @transform_3(%arg0: i32, %arg1: i32) -> (i32, i32) {
    %c0_i32 = arith.constant 0 : i32
    %c0_i32_0 = arith.constant 0 : i32
    return %arg1, %c0_i32 : i32, i32
  }
  func.func @transform_4(%arg0: i32, %arg1: i32) -> (i32, i32) {
    %c0_i32 = arith.constant 0 : i32
    %c0_i32_0 = arith.constant 0 : i32
    %c0_i32_1 = arith.constant 0 : i32
    return %c0_i32, %c0_i32_0 : i32, i32
  }
  func.func @transform_5(%arg0: i32, %arg1: i32) -> (i32, i32) {
    %c0_i32 = arith.constant 0 : i32
    %c0_i32_0 = arith.constant 0 : i32
    return %arg0, %c0_i32 : i32, i32
  }
}

</mosaic_0001>

<bundles_post_ra>
// kernel: mlp_forward.1
= control target key start
LH: loop header
LB: loop body
LE: loop exit
PB: predicated region body
PF: predicated region fallthrough
CT: control target
= control target key end

     0   :  { %10 = vsyncpa [#allocation3], 0  ;;  %s2842_s0 = inlined_call_operand.vmem [shape: bf16[16,256], index: 0, kind: input, shape index: {}]   ;;  %s2843_s1 = inlined_call_operand.hbm [shape: bf16[256,1024], index: 1, kind: input, shape index: {}]   ;;  %s2844_s2 = inlined_call_operand.vmem [shape: f32[1,1024], index: 2, kind: input, shape index: {}]   ;;  %s2845_s3 = inlined_call_operand.hbm [shape: bf16[1024,256], index: 3, kind: input, shape index: {}]   ;;  %s2846_s4 = inlined_call_operand.vmem [shape: f32[1,256], index: 4, kind: input, shape index: {}]   ;;  %s2847_s5 = inlined_call_operand.hbm [shape: f32[16,256], index: 5, kind: output, shape index: {}]  }
   0x1   :  { %11 = vsyncpa [#allocation6], 0 }
   0x2   :  { %12 = vsyncpa [#allocation4], 0  ;;  %s2715_s18 = smov [#allocation2]   ;;  %s2643_s22 = scalar_lea.hbm %s2843_s1, 16384 }
   0x3   :  { %s20_s19 = sshll.u32 %s2715_s18, 4  ;;  %p2644_p0 = scmp.ne.s32.totalorder %s2843_s1, %s2643_s22  ;;  %s21_s19 = int_to_ptr.vmem [resolvable:$true] %s20_s19 }
   0x4   :  { %p2647_p1 = scmp.lt.u32.totalorder %s2643_s22, %s2843_s1 }
   0x6   :  { %p2649_p2 = pnand %p2647_p1, %p2644_p0 }
   0x8   :  { %2652 = shalt.err (!%p2649_p2)
}
   0x9   :  { %s2653_s27 = scalar_lea.vmem %s21_s19, 16384  ;;  %p2658_p4 = scmp.lt.s32.totalorder %s21_s19, %s21_s19 }
   0xa   :  { %p2654_p3 = scmp.ne.s32.totalorder %s21_s19, %s2653_s27  ;;  %p2659_p5 = scmp.lt.s32.totalorder %s2653_s27, %s2653_s27 }
   0xc   :  { %p2660_p6 = por %p2659_p5, %p2658_p4 }
   0xe   :  { %p2661_p7 = pnand %p2660_p6, %p2654_p3 }
  0x10   :  { %2664 = shalt.err (!%p2661_p7)
}
  0x11   :  { %s2716_s28 = smov 512   ;;  %s2717_s29 = smov 32  }
  0x12   :  { %26 = dma.hbm_to_vmem [thread:$0]  %s2843_s1, 16384, %s21_s19, [#allocation3], %s2716_s28, %s2716_s28, %s2717_s29  }
  0x13   :  { %s2718_s7 = smov [#allocation5]   ;;  %s2665_s11 = scalar_lea.hbm %s2845_s3, 16384 }
  0x14   :  { %s34_s8 = sshll.u32 %s2718_s7, 4  ;;  %p2666_p8 = scmp.ne.s32.totalorder %s2845_s3, %s2665_s11  ;;  %s35_s8 = int_to_ptr.vmem [resolvable:$true] %s34_s8 }
  0x15   :  { %p2669_p9 = scmp.lt.u32.totalorder %s2665_s11, %s2845_s3 }
  0x17   :  { %p2671_p10 = pnand %p2669_p9, %p2666_p8 }
  0x19   :  { %2674 = shalt.err (!%p2671_p10)
}
  0x1a   :  { %s2675_s16 = scalar_lea.vmem %s35_s8, 16384  ;;  %p2680_p12 = scmp.lt.s32.totalorder %s35_s8, %s35_s8 }
  0x1b   :  { %p2676_p11 = scmp.ne.s32.totalorder %s35_s8, %s2675_s16  ;;  %p2681_p13 = scmp.lt.s32.totalorder %s2675_s16, %s2675_s16 }
  0x1d   :  { %p2682_p0 = por %p2681_p13, %p2680_p12 }
  0x1f   :  { %p2683_p1 = pnand %p2682_p0, %p2676_p11 }
  0x21   :  { %2686 = shalt.err (!%p2683_p1)
}
  0x22   :  { %s2719_s1 = smov 128   ;;  %s2720_s17 = smov 8  }
  0x23   :  { %40 = dma.hbm_to_vmem [thread:$0]  %s2845_s3, 16384, %s35_s8, [#allocation6], %s2719_s1, %s2719_s1, %s2720_s17  }
  0x24   :  { %2709 = dma.done.wait [#allocation3], 16384  }
  0x25   :  { %2710 = vsyncadd [#allocation3], 4294950912 }
  0x26   :  { %2711 = dma.done.wait [#allocation6], 16384  }
  0x27   :  { %2712 = vsyncadd [#allocation6], 4294950912  ;;  %v59_v0 = vld [vmem:[#allocation2] sm:$0xff]  ;;  %v60_v63 = vld [vmem:[#allocation2 + $0x8] sm:$0xff]  ;;  %s2721_s25 = smov [#allocation7]  }
  0x28   :  { %v63_v1 = vld [vmem:[#allocation2 + $0x20] sm:$0xff]  ;;  %s2123_s26 = sshll.u32 %s2721_s25, 4  ;;  %s2124_s26 = int_to_ptr.vmem [resolvable:$true] %s2123_s26 }
  0x29   :  { %v67_v2 = vld [vmem:[#allocation2 + $0x40] sm:$0xff]  ;;  %v2139_v3 = vcombine.high %v59_v0, %v63_v1  ;;  %v2138_v4 = vcombine.low %v59_v0, %v63_v1  ;;  %v64_v0 = vld [vmem:[#allocation2 + $0x28] sm:$0xff]  ;;  %p2692_p3 = scmp.lt.s32.totalorder %s2124_s26, %s2124_s26 }
  0x2a   :  { %v71_v5 = vld [vmem:[#allocation2 + $0x60] sm:$0xff] }
  0x2b   :  { %v2147_v6 = vcombine.high %v67_v2, %v71_v5  ;;  %v75_v7 = vld [vmem:[#allocation2 + $0x80] sm:$0xff]  ;;  %879 = vmatprep.subr.bf16.mxu1 %v2139_v3  ;;  %v2146_v9 = vcombine.low %v67_v2, %v71_v5  ;;  %v68_v3 = vld [vmem:[#allocation2 + $0x48] sm:$0xff] }
  0x2c   :  { %v79_v8 = vld [vmem:[#allocation2 + $0xa0] sm:$0xff]  ;;  %880 = vmatpush1.bf16.msra.mxu1 %v2138_v4  ;;  %v72_v4 = vld [vmem:[#allocation2 + $0x68] sm:$0xff] }
  0x2d   :  { %881 = vmatprep.subr.bf16.mxu1 %v2147_v6  ;;  %v2155_v10 = vcombine.high %v75_v7, %v79_v8  ;;  %v83_v11 = vld [vmem:[#allocation2 + $0xc0] sm:$0xff]  ;;  %v2154_v13 = vcombine.low %v75_v7, %v79_v8  ;;  %v2141_v6 = vcombine.high %v60_v63, %v64_v0  ;;  %v2140_v7 = vcombine.low %v60_v63, %v64_v0  ;;  %v76_v8 = vld [vmem:[#allocation2 + $0x88] sm:$0xff]  ;;  %v2424_v63 = vld [vmem:[#allocation5 + $0x10] ss:$8 sps:$4 sm:$0xff]  }
  0x2e   :  { %v87_v12 = vld [vmem:[#allocation2 + $0xe0] sm:$0xff] }
  0x2f   :  { %v2163_v14 = vcombine.high %v83_v11, %v87_v12  ;;  %v91_v15 = vld [vmem:[#allocation2 + $0x100] sm:$0xff]  ;;  %v2162_v18 = vcombine.low %v83_v11, %v87_v12  ;;  %v2148_v11 = vcombine.low %v68_v3, %v72_v4  ;;  %v84_v12 = vld [vmem:[#allocation2 + $0xc8] sm:$0xff] }
  0x30   :  { %882 = vmatpush1.bf16.msra.mxu1 %v2146_v9  ;;  %v95_v16 = vld [vmem:[#allocation2 + $0x120] sm:$0xff]  ;;  %v80_v9 = vld [vmem:[#allocation2 + $0xa8] sm:$0xff] }
  0x31   :  { %883 = vmatprep.subr.bf16.mxu1 %v2155_v10  ;;  %v2781_v17 = vld [vmem:[%s2842_s0 + $0x4] ss:$8 sps:$4 sm:$0xff]   ;;  %v2171_v19 = vcombine.high %v91_v15, %v95_v16  ;;  %v2170_v22 = vcombine.low %v91_v15, %v95_v16  ;;  %v2787_v5 = vld [vmem:[%s2842_s0] ss:$8 sps:$4 sm:$0xff]   ;;  %v2149_v10 = vcombine.high %v68_v3, %v72_v4  ;;  %v2156_v15 = vcombine.low %v76_v8, %v80_v9 }
  0x32   :  { %911 = vmatprep.mubr.bf16.mxu1 %v2781_v17  ;;  %v99_v20 = vld [vmem:[#allocation2 + $0x140] sm:$0xff]  ;;  %v92_v16 = vld [vmem:[#allocation2 + $0x108] sm:$0xff] }
  0x33   :  { %v103_v21 = vld [vmem:[#allocation2 + $0x160] sm:$0xff]  ;;  %v184_v3 = vld [vmem:[#allocation2 + $0x3e8] sm:$0xff] }
  0x34   :  { %884 = vmatpush1.bf16.msra.mxu1 %v2154_v13  ;;  %v2179_v23 = vcombine.high %v99_v20, %v103_v21  ;;  %v107_v24 = vld [vmem:[#allocation2 + $0x180] sm:$0xff]  ;;  %v2178_v26 = vcombine.low %v99_v20, %v103_v21  ;;  %v88_v13 = vld [vmem:[#allocation2 + $0xe8] sm:$0xff] }
  0x35   :  { %885 = vmatprep.subr.bf16.mxu1 %v2163_v14  ;;  %v111_v25 = vld [vmem:[#allocation2 + $0x1a0] sm:$0xff]  ;;  %v2157_v14 = vcombine.high %v76_v8, %v80_v9  ;;  %v2164_v20 = vcombine.low %v84_v12, %v88_v13  ;;  %v100_v21 = vld [vmem:[#allocation2 + $0x148] sm:$0xff]  ;;  %v61_v9 = vld [vmem:[#allocation2 + $0x10] sm:$0xff] }
  0x36   :  { %v2187_v27 = vcombine.high %v107_v24, %v111_v25  ;;  %v115_v28 = vld [vmem:[#allocation2 + $0x1c0] sm:$0xff]  ;;  %v2186_v30 = vcombine.low %v107_v24, %v111_v25 }
  0x37   :  { %v119_v29 = vld [vmem:[#allocation2 + $0x1e0] sm:$0xff] }
  0x38   :  { %886 = vmatpush1.bf16.msra.mxu1 %v2162_v18  ;;  %v2195_v31 = vcombine.high %v115_v28, %v119_v29  ;;  %v123_v32 = vld [vmem:[#allocation2 + $0x200] sm:$0xff]  ;;  %v2194_v34 = vcombine.low %v115_v28, %v119_v29  ;;  %v96_v18 = vld [vmem:[#allocation2 + $0x128] sm:$0xff] }
  0x39   :  { %887 = vmatprep.subr.bf16.mxu1 %v2171_v19  ;;  %v127_v33 = vld [vmem:[#allocation2 + $0x220] sm:$0xff]  ;;  %v2165_v19 = vcombine.high %v84_v12, %v88_v13  ;;  %v2172_v24 = vcombine.low %v92_v16, %v96_v18  ;;  %v2430_v12 = vld [vmem:[#allocation5 + $0x30] ss:$8 sps:$4 sm:$0xff]  }
  0x3a   :  { %v131_v35 = vld [vmem:[#allocation2 + $0x240] sm:$0xff]  ;;  %v2203_v37 = vcombine.high %v123_v32, %v127_v33  ;;  %v2202_v38 = vcombine.low %v123_v32, %v127_v33 }
  0x3b   :  { %v135_v36 = vld [vmem:[#allocation2 + $0x260] sm:$0xff] }
  0x3c   :  { %888 = vmatpush1.bf16.msra.mxu1 %v2170_v22  ;;  %v139_v39 = vld [vmem:[#allocation2 + $0x280] sm:$0xff]  ;;  %v2211_v41 = vcombine.high %v131_v35, %v135_v36  ;;  %v2210_v42 = vcombine.low %v131_v35, %v135_v36  ;;  %v2173_v22 = vcombine.high %v92_v16, %v96_v18  ;;  %v128_v35 = vld [vmem:[#allocation2 + $0x228] sm:$0xff]  ;;  %v73_v16 = vld [vmem:[#allocation2 + $0x70] sm:$0xff] }
  0x3d   :  { %889 = vmatprep.subr.bf16.mxu1 %v2179_v23  ;;  %v143_v40 = vld [vmem:[#allocation2 + $0x2a0] sm:$0xff]  ;;  %v104_v23 = vld [vmem:[#allocation2 + $0x168] sm:$0xff] }
  0x3e   :  { %v147_v43 = vld [vmem:[#allocation2 + $0x2c0] sm:$0xff]  ;;  %v2219_v45 = vcombine.high %v139_v39, %v143_v40  ;;  %v2218_v46 = vcombine.low %v139_v39, %v143_v40  ;;  %v2181_v25 = vcombine.high %v100_v21, %v104_v23  ;;  %v2180_v28 = vcombine.low %v100_v21, %v104_v23  ;;  %v136_v39 = vld [vmem:[#allocation2 + $0x268] sm:$0xff]  ;;  %v81_v23 = vld [vmem:[#allocation2 + $0xb0] sm:$0xff] }
  0x3f   :  { %v151_v44 = vld [vmem:[#allocation2 + $0x2e0] sm:$0xff] }
  0x40   :  { %890 = vmatpush1.bf16.msra.mxu1 %v2178_v26  ;;  %v155_v47 = vld [vmem:[#allocation2 + $0x300] sm:$0xff]  ;;  %v2227_v49 = vcombine.high %v147_v43, %v151_v44  ;;  %v2226_v50 = vcombine.low %v147_v43, %v151_v44  ;;  %v108_v26 = vld [vmem:[#allocation2 + $0x188] sm:$0xff] }
  0x41   :  { %891 = vmatprep.subr.bf16.mxu1 %v2187_v27  ;;  %v159_v48 = vld [vmem:[#allocation2 + $0x320] sm:$0xff]  ;;  %v112_v27 = vld [vmem:[#allocation2 + $0x1a8] sm:$0xff] }
  0x42   :  { %v163_v51 = vld [vmem:[#allocation2 + $0x340] sm:$0xff]  ;;  %v2235_v53 = vcombine.high %v155_v47, %v159_v48  ;;  %v2234_v54 = vcombine.low %v155_v47, %v159_v48  ;;  %v2189_v29 = vcombine.high %v108_v26, %v112_v27  ;;  %v2188_v32 = vcombine.low %v108_v26, %v112_v27  ;;  %v144_v43 = vld [vmem:[#allocation2 + $0x2a8] sm:$0xff] }
  0x43   :  { %v167_v52 = vld [vmem:[#allocation2 + $0x360] sm:$0xff]  ;;  %v152_v47 = vld [vmem:[#allocation2 + $0x2e8] sm:$0xff] }
  0x44   :  { %892 = vmatpush1.bf16.msra.mxu1 %v2186_v30  ;;  %v171_v55 = vld [vmem:[#allocation2 + $0x380] sm:$0xff]  ;;  %v2243_v57 = vcombine.high %v163_v51, %v167_v52  ;;  %v2242_v58 = vcombine.low %v163_v51, %v167_v52  ;;  %v116_v30 = vld [vmem:[#allocation2 + $0x1c8] sm:$0xff] }
  0x45   :  { %893 = vmatprep.subr.bf16.mxu1 %v2195_v31  ;;  %v175_v56 = vld [vmem:[#allocation2 + $0x3a0] sm:$0xff]  ;;  %v120_v31 = vld [vmem:[#allocation2 + $0x1e8] sm:$0xff] }
  0x46   :  { %v179_v59 = vld [vmem:[#allocation2 + $0x3c0] sm:$0xff]  ;;  %v2251_v61 = vcombine.high %v171_v55, %v175_v56  ;;  %v2250_v62 = vcombine.low %v171_v55, %v175_v56  ;;  %v2197_v33 = vcombine.high %v116_v30, %v120_v31  ;;  %v2196_v36 = vcombine.low %v116_v30, %v120_v31  ;;  %v160_v51 = vld [vmem:[#allocation2 + $0x328] sm:$0xff]  ;;  %v89_v30 = vld [vmem:[#allocation2 + $0xf0] sm:$0xff] }
  0x47   :  { %v183_v60 = vld [vmem:[#allocation2 + $0x3e0] sm:$0xff]  ;;  %v168_v55 = vld [vmem:[#allocation2 + $0x368] sm:$0xff] }
  0x48   :  { %894 = vmatpush1.bf16.msra.mxu1 %v2194_v34  ;;  %v2259_v1 = vcombine.high %v179_v59, %v183_v60  ;;  %v2258_v2 = vcombine.low %v179_v59, %v183_v60  ;;  %v124_v34 = vld [vmem:[#allocation2 + $0x208] sm:$0xff] }
  0x49   :  { %895 = vmatprep.subr.bf16.mxu1 %v2203_v37  ;;  %v2205_v37 = vcombine.high %v124_v34, %v128_v35  ;;  %v2204_v40 = vcombine.low %v124_v34, %v128_v35  ;;  %v2419_v56 = vld [vmem:[#allocation5 + $0x4] ss:$8 sps:$4 sm:$0xff]   ;;  %v2439_v31 = vld [vmem:[#allocation5 + $0x60] ss:$8 sps:$4 sm:$0xff]   ;;  %v93_v35 = vld [vmem:[#allocation2 + $0x110] sm:$0xff] }
  0x4a   :  { %1911 = vmatprep.subr.bf16.mxu0 %v2419_v56  ;;  %v172_v60 = vld [vmem:[#allocation2 + $0x388] sm:$0xff] }
  0x4b   :  { %v2425_v4 = vld [vmem:[#allocation5 + $0x24] ss:$8 sps:$4 sm:$0xff]  }
  0x4c   :  { %896 = vmatpush1.bf16.msra.mxu1 %v2202_v38  ;;  %v132_v38 = vld [vmem:[#allocation2 + $0x248] sm:$0xff] }
  0x4d   :  { %897 = vmatprep.subr.bf16.mxu1 %v2211_v41  ;;  %v2213_v41 = vcombine.high %v132_v38, %v136_v39  ;;  %v2212_v44 = vcombine.low %v132_v38, %v136_v39  ;;  %v2431_v18 = vld [vmem:[#allocation5 + $0x44] ss:$8 sps:$4 sm:$0xff]  }
  0x4e   :  { %v2437_v26 = vld [vmem:[#allocation5 + $0x64] ss:$8 sps:$4 sm:$0xff]  }
  0x4f   :  { %v2443_v38 = vld [vmem:[#allocation5 + $0x84] ss:$8 sps:$4 sm:$0xff]  }
  0x50   :  { %898 = vmatpush1.bf16.msra.mxu1 %v2210_v42  ;;  %v140_v42 = vld [vmem:[#allocation2 + $0x288] sm:$0xff] }
  0x51   :  { %899 = vmatprep.subr.bf16.mxu1 %v2219_v45  ;;  %v2221_v45 = vcombine.high %v140_v42, %v144_v43  ;;  %v2220_v48 = vcombine.low %v140_v42, %v144_v43  ;;  %v105_v42 = vld [vmem:[#allocation2 + $0x170] sm:$0xff]  ;;  %v2445_v43 = vld [vmem:[#allocation5 + $0x80] ss:$8 sps:$4 sm:$0xff]  }
  0x54   :  { %900 = vmatpush1.bf16.msra.mxu1 %v2218_v46  ;;  %v148_v46 = vld [vmem:[#allocation2 + $0x2c8] sm:$0xff] }
  0x55   :  { %901 = vmatprep.subr.bf16.mxu1 %v2227_v49  ;;  %v2229_v49 = vcombine.high %v148_v46, %v152_v47  ;;  %v2228_v52 = vcombine.low %v148_v46, %v152_v47  ;;  %v109_v47 = vld [vmem:[#allocation2 + $0x190] sm:$0xff] }
  0x58   :  { %902 = vmatpush1.bf16.msra.mxu1 %v2226_v50  ;;  %v156_v50 = vld [vmem:[#allocation2 + $0x308] sm:$0xff] }
  0x59   :  { %903 = vmatprep.subr.bf16.mxu1 %v2235_v53  ;;  %v2237_v53 = vcombine.high %v156_v50, %v160_v51 }
  0x5c   :  { %904 = vmatpush1.bf16.msra.mxu1 %v2234_v54  ;;  %v164_v54 = vld [vmem:[#allocation2 + $0x348] sm:$0xff] }
  0x5d   :  { %905 = vmatprep.subr.bf16.mxu1 %v2243_v57  ;;  %v2421_v57 = vld [vmem:[#allocation5] ss:$8 sps:$4 sm:$0xff]   ;;  %v2245_v59 = vcombine.high %v164_v54, %v168_v55  ;;  %v2244_v0 = vcombine.low %v164_v54, %v168_v55  ;;  %v2449_v54 = vld [vmem:[#allocation5 + $0xa4] ss:$8 sps:$4 sm:$0xff]  }
  0x5e   :  { %1912 = vmatpush1.bf16.msra.mxu0 %v2421_v57  ;;  %v2451_v55 = vld [vmem:[#allocation5 + $0xa0] ss:$8 sps:$4 sm:$0xff]  }
  0x60   :  { %906 = vmatpush1.bf16.msra.mxu1 %v2242_v58  ;;  %v2236_v58 = vcombine.low %v156_v50, %v160_v51 }
  0x61   :  { %907 = vmatprep.subr.bf16.mxu1 %v2251_v61  ;;  %v176_v61 = vld [vmem:[#allocation2 + $0x3a8] sm:$0xff] }
  0x64   :  { %908 = vmatpush1.bf16.msra.mxu1 %v2250_v62  ;;  %v2422_v62 = vld [vmem:[#allocation5 + $0x14] ss:$8 sps:$4 sm:$0xff]  }
  0x65   :  { %909 = vmatprep.subr.bf16.mxu1 %v2259_v1  ;;  %1913 = vmatprep.subr.bf16.mxu0 %v2422_v62  ;;  %v2253_v1 = vcombine.high %v172_v60, %v176_v61 }
  0x66   :  { %1914 = vmatpush1.bf16.msra.mxu0 %v2424_v63 }
  0x67   :  { %1915 = vmatprep.subr.bf16.mxu0 %v2425_v4 }
  0x68   :  { %910 = vmatpush1.bf16.msra.mxu1 %v2258_v2  ;;  %v180_v2 = vld [vmem:[#allocation2 + $0x3c8] sm:$0xff] }
  0x69   :  { %922 = vmatprep.subr.bf16.mxu1 %v2141_v6  ;;  %v2427_v6 = vld [vmem:[#allocation5 + $0x20] ss:$8 sps:$4 sm:$0xff]   ;;  %v2261_v8 = vcombine.high %v180_v2, %v184_v3  ;;  %v2260_v13 = vcombine.low %v180_v2, %v184_v3  ;;  %v2455_v2 = vld [vmem:[#allocation5 + $0xc4] ss:$8 sps:$4 sm:$0xff]  }
  0x6a   :  { %1916 = vmatpush1.bf16.msra.mxu0 %v2427_v6  ;;  %v2457_v3 = vld [vmem:[#allocation5 + $0xc0] ss:$8 sps:$4 sm:$0xff]  }
  0x6b   :  { %912 = vmatmul.mubr.bf16.vlgmr.msra.gmra.mrb[0].mxu1 %v2787_v5 }
  0x6c   :  { %923 = vmatpush1.bf16.msra.mxu1 %v2140_v7  ;;  %954 = vmatprep.mubr.bf16.mxu1 %v2781_v17  ;;  %v2252_v7 = vcombine.low %v172_v60, %v176_v61  ;;  %v2452_v60 = vld [vmem:[#allocation5 + $0xb4] ss:$8 sps:$4 sm:$0xff]   ;;  %v2454_v61 = vld [vmem:[#allocation5 + $0xb0] ss:$8 sps:$4 sm:$0xff]  }
  0x6d   :  { %924 = vmatprep.subr.bf16.mxu1 %v2149_v10  ;;  %v65_v10 = vld [vmem:[#allocation2 + $0x30] sm:$0xff] }
  0x70   :  { %925 = vmatpush1.bf16.msra.mxu1 %v2148_v11  ;;  %v2428_v11 = vld [vmem:[#allocation5 + $0x34] ss:$8 sps:$4 sm:$0xff]  }
  0x71   :  { %926 = vmatprep.subr.bf16.mxu1 %v2157_v14  ;;  %1917 = vmatprep.subr.bf16.mxu0 %v2428_v11  ;;  %v2143_v14 = vcombine.high %v61_v9, %v65_v10 }
  0x72   :  { %1918 = vmatpush1.bf16.msra.mxu0 %v2430_v12 }
  0x73   :  { %1919 = vmatprep.subr.bf16.mxu0 %v2431_v18 }
  0x74   :  { %927 = vmatpush1.bf16.msra.mxu1 %v2156_v15  ;;  %v69_v15 = vld [vmem:[#allocation2 + $0x50] sm:$0xff] }
  0x75   :  { %928 = vmatprep.subr.bf16.mxu1 %v2165_v19  ;;  %v2433_v19 = vld [vmem:[#allocation5 + $0x40] ss:$8 sps:$4 sm:$0xff]   ;;  %v2151_v21 = vcombine.high %v69_v15, %v73_v16  ;;  %v2150_v27 = vcombine.low %v69_v15, %v73_v16  ;;  %v2461_v15 = vld [vmem:[#allocation5 + $0xe4] ss:$8 sps:$4 sm:$0xff]  }
  0x76   :  { %1920 = vmatpush1.bf16.msra.mxu0 %v2433_v19  ;;  %v2463_v16 = vld [vmem:[#allocation5 + $0xe0] ss:$8 sps:$4 sm:$0xff]  }
  0x78   :  { %929 = vmatpush1.bf16.msra.mxu1 %v2164_v20  ;;  %v2142_v20 = vcombine.low %v61_v9, %v65_v10  ;;  %v2458_v9 = vld [vmem:[#allocation5 + $0xd4] ss:$8 sps:$4 sm:$0xff]   ;;  %v2460_v10 = vld [vmem:[#allocation5 + $0xd0] ss:$8 sps:$4 sm:$0xff]  }
  0x79   :  { %930 = vmatprep.subr.bf16.mxu1 %v2173_v22  ;;  %v77_v22 = vld [vmem:[#allocation2 + $0x90] sm:$0xff] }
  0x7c   :  { %931 = vmatpush1.bf16.msra.mxu1 %v2172_v24  ;;  %v2434_v24 = vld [vmem:[#allocation5 + $0x54] ss:$8 sps:$4 sm:$0xff]  }
  0x7d   :  { %932 = vmatprep.subr.bf16.mxu1 %v2181_v25  ;;  %v2436_v25 = vld [vmem:[#allocation5 + $0x50] ss:$8 sps:$4 sm:$0xff]   ;;  %1921 = vmatprep.subr.bf16.mxu0 %v2434_v24 }
  0x7e   :  { %1922 = vmatpush1.bf16.msra.mxu0 %v2436_v25 }
  0x7f   :  { %1923 = vmatprep.subr.bf16.mxu0 %v2437_v26  ;;  %v165_v26 = vld [vmem:[#allocation2 + $0x350] sm:$0xff] }
  0x80   :  { %933 = vmatpush1.bf16.msra.mxu1 %v2180_v28  ;;  %v2159_v28 = vcombine.high %v77_v22, %v81_v23 }
  0x81   :  { %934 = vmatprep.subr.bf16.mxu1 %v2189_v29  ;;  %v85_v29 = vld [vmem:[#allocation2 + $0xd0] sm:$0xff] }
  0x82   :  { %v2167_v34 = vcombine.high %v85_v29, %v89_v30  ;;  %1924 = vmatpush1.bf16.msra.mxu0 %v2439_v31  ;;  %v2166_v39 = vcombine.low %v85_v29, %v89_v30  ;;  %v173_v31 = vld [vmem:[#allocation2 + $0x390] sm:$0xff] }
  0x84   :  { %935 = vmatpush1.bf16.msra.mxu1 %v2188_v32  ;;  %v2440_v32 = vld [vmem:[#allocation5 + $0x74] ss:$8 sps:$4 sm:$0xff]  }
  0x85   :  { %936 = vmatprep.subr.bf16.mxu1 %v2197_v33  ;;  %v2158_v33 = vcombine.low %v77_v22, %v81_v23  ;;  %1925 = vmatprep.subr.bf16.mxu0 %v2440_v32  ;;  %v2464_v22 = vld [vmem:[#allocation5 + $0xf4] ss:$8 sps:$4 sm:$0xff]   ;;  %v2466_v23 = vld [vmem:[#allocation5 + $0xf0] ss:$8 sps:$4 sm:$0xff]  }
  0x86   :  { %v177_v32 = vld [vmem:[#allocation2 + $0x3b0] sm:$0xff] }
  0x88   :  { %937 = vmatpush1.bf16.msra.mxu1 %v2196_v36  ;;  %v97_v36 = vld [vmem:[#allocation2 + $0x130] sm:$0xff] }
  0x89   :  { %938 = vmatprep.subr.bf16.mxu1 %v2205_v37  ;;  %v2442_v37 = vld [vmem:[#allocation5 + $0x70] ss:$8 sps:$4 sm:$0xff]  }
  0x8a   :  { %1926 = vmatpush1.bf16.msra.mxu0 %v2442_v37  ;;  %v2254_v37 = vcombine.low %v173_v31, %v177_v32 }
  0x8b   :  { %1927 = vmatprep.subr.bf16.mxu0 %v2443_v38 }
  0x8c   :  { %939 = vmatpush1.bf16.msra.mxu1 %v2204_v40  ;;  %v2175_v40 = vcombine.high %v93_v35, %v97_v36 }
  0x8d   :  { %940 = vmatprep.subr.bf16.mxu1 %v2213_v41  ;;  %v101_v41 = vld [vmem:[#allocation2 + $0x150] sm:$0xff] }
  0x8e   :  { %v2183_v46 = vcombine.high %v101_v41, %v105_v42  ;;  %1928 = vmatpush1.bf16.msra.mxu0 %v2445_v43  ;;  %v2182_v50 = vcombine.low %v101_v41, %v105_v42  ;;  %v70_v43 = vld [vmem:[#allocation2 + $0x58] sm:$0xff] }
  0x90   :  { %941 = vmatpush1.bf16.msra.mxu1 %v2212_v44  ;;  %v2446_v44 = vld [vmem:[#allocation5 + $0x94] ss:$8 sps:$4 sm:$0xff]  }
  0x91   :  { %942 = vmatprep.subr.bf16.mxu1 %v2221_v45  ;;  %v2174_v45 = vcombine.low %v93_v35, %v97_v36  ;;  %1929 = vmatprep.subr.bf16.mxu0 %v2446_v44  ;;  %v181_v35 = vld [vmem:[#allocation2 + $0x3d0] sm:$0xff]  ;;  %v74_v44 = vld [vmem:[#allocation2 + $0x78] sm:$0xff] }
  0x92   :  { %v185_v36 = vld [vmem:[#allocation2 + $0x3f0] sm:$0xff] }
  0x93   :  { %v2263_v38 = vcombine.high %v181_v35, %v185_v36  ;;  %v2262_v41 = vcombine.low %v181_v35, %v185_v36  ;;  %v182_v36 = vld [vmem:[#allocation2 + $0x3d8] sm:$0xff] }
  0x94   :  { %943 = vmatpush1.bf16.msra.mxu1 %v2220_v48  ;;  %v113_v48 = vld [vmem:[#allocation2 + $0x1b0] sm:$0xff] }
  0x95   :  { %944 = vmatprep.subr.bf16.mxu1 %v2229_v49  ;;  %v2448_v49 = vld [vmem:[#allocation5 + $0x90] ss:$8 sps:$4 sm:$0xff]   ;;  %v2191_v51 = vcombine.high %v109_v47, %v113_v48  ;;  %v2190_v56 = vcombine.low %v109_v47, %v113_v48 }
  0x96   :  { %1930 = vmatpush1.bf16.msra.mxu0 %v2448_v49  ;;  %v78_v47 = vld [vmem:[#allocation2 + $0x98] sm:$0xff]  ;;  %v2152_v49 = vcombine.low %v70_v43, %v74_v44 }
  0x97   :  { %1931 = vmatprep.subr.bf16.mxu0 %v2449_v54  ;;  %v82_v48 = vld [vmem:[#allocation2 + $0xb8] sm:$0xff] }
  0x98   :  { %945 = vmatpush1.bf16.msra.mxu1 %v2228_v52  ;;  %v117_v52 = vld [vmem:[#allocation2 + $0x1d0] sm:$0xff] }
  0x99   :  { %946 = vmatprep.subr.bf16.mxu1 %v2237_v53  ;;  %v121_v53 = vld [vmem:[#allocation2 + $0x1f0] sm:$0xff] }
  0x9a   :  { %v2199_v57 = vcombine.high %v117_v52, %v121_v53  ;;  %1932 = vmatpush1.bf16.msra.mxu0 %v2451_v55  ;;  %v2198_v62 = vcombine.low %v117_v52, %v121_v53  ;;  %v90_v52 = vld [vmem:[#allocation2 + $0xf8] sm:$0xff]  ;;  %v2160_v53 = vcombine.low %v78_v47, %v82_v48 }
  0x9b   :  { %1933 = vmatprep.subr.bf16.mxu0 %v2452_v60  ;;  %v94_v55 = vld [vmem:[#allocation2 + $0x118] sm:$0xff] }
  0x9c   :  { %947 = vmatpush1.bf16.msra.mxu1 %v2236_v58  ;;  %v125_v58 = vld [vmem:[#allocation2 + $0x210] sm:$0xff]  ;;  %v106_v60 = vld [vmem:[#allocation2 + $0x178] sm:$0xff] }
  0x9d   :  { %948 = vmatprep.subr.bf16.mxu1 %v2245_v59  ;;  %v129_v59 = vld [vmem:[#allocation2 + $0x230] sm:$0xff] }
  0x9e   :  { %v2207_v63 = vcombine.high %v125_v58, %v129_v59  ;;  %1934 = vmatpush1.bf16.msra.mxu0 %v2454_v61  ;;  %v2206_v4 = vcombine.low %v125_v58, %v129_v59  ;;  %v102_v59 = vld [vmem:[#allocation2 + $0x158] sm:$0xff] }
  0x9f   :  { %1935 = vmatprep.subr.bf16.mxu0 %v2455_v2  ;;  %v118_v2 = vld [vmem:[#allocation2 + $0x1d8] sm:$0xff] }
  0xa0   :  { %949 = vmatpush1.bf16.msra.mxu1 %v2244_v0  ;;  %v133_v0 = vld [vmem:[#allocation2 + $0x250] sm:$0xff] }
  0xa1   :  { %950 = vmatprep.subr.bf16.mxu1 %v2253_v1  ;;  %v137_v1 = vld [vmem:[#allocation2 + $0x270] sm:$0xff] }
  0xa2   :  { %v2215_v6 = vcombine.high %v133_v0, %v137_v1  ;;  %1936 = vmatpush1.bf16.msra.mxu0 %v2457_v3  ;;  %v2214_v11 = vcombine.low %v133_v0, %v137_v1  ;;  %v2184_v0 = vcombine.low %v102_v59, %v106_v60  ;;  %v122_v3 = vld [vmem:[#allocation2 + $0x1f8] sm:$0xff] }
  0xa3   :  { %1937 = vmatprep.subr.bf16.mxu0 %v2458_v9  ;;  %v2200_v9 = vcombine.low %v118_v2, %v122_v3 }
  0xa4   :  { %951 = vmatpush1.bf16.msra.mxu1 %v2252_v7  ;;  %v141_v7 = vld [vmem:[#allocation2 + $0x290] sm:$0xff] }
  0xa5   :  { %952 = vmatprep.subr.bf16.mxu1 %v2261_v8  ;;  %v145_v8 = vld [vmem:[#allocation2 + $0x2b0] sm:$0xff] }
  0xa6   :  { %v2223_v12 = vcombine.high %v141_v7, %v145_v8  ;;  %1938 = vmatpush1.bf16.msra.mxu0 %v2460_v10  ;;  %v2222_v18 = vcombine.low %v141_v7, %v145_v8  ;;  %v126_v7 = vld [vmem:[#allocation2 + $0x218] sm:$0xff] }
  0xa7   :  { %1939 = vmatprep.subr.bf16.mxu0 %v2461_v15  ;;  %v130_v8 = vld [vmem:[#allocation2 + $0x238] sm:$0xff] }
  0xa8   :  { %953 = vmatpush1.bf16.msra.mxu1 %v2260_v13  ;;  %v149_v13 = vld [vmem:[#allocation2 + $0x2d0] sm:$0xff]  ;;  %v2209_v10 = vcombine.high %v126_v7, %v130_v8  ;;  %v142_v15 = vld [vmem:[#allocation2 + $0x298] sm:$0xff] }
  0xa9   :  { %965 = vmatprep.subr.bf16.mxu1 %v2143_v14  ;;  %v153_v14 = vld [vmem:[#allocation2 + $0x2f0] sm:$0xff] }
  0xaa   :  { %v2231_v19 = vcombine.high %v149_v13, %v153_v14  ;;  %1940 = vmatpush1.bf16.msra.mxu0 %v2463_v16  ;;  %v2230_v24 = vcombine.low %v149_v13, %v153_v14  ;;  %v2208_v13 = vcombine.low %v126_v7, %v130_v8  ;;  %v146_v16 = vld [vmem:[#allocation2 + $0x2b8] sm:$0xff] }
  0xab   :  { %955 = vmatmul.mubr.bf16.vlgmr.msra.gmra.mrb[4].mxu1 %v2787_v5  ;;  %1941 = vmatprep.subr.bf16.mxu0 %v2464_v22  ;;  %v2224_v22 = vcombine.low %v142_v15, %v146_v16 }
  0xac   :  { %966 = vmatpush1.bf16.msra.mxu1 %v2142_v20  ;;  %997 = vmatprep.mubr.bf16.mxu1 %v2781_v17  ;;  %v157_v20 = vld [vmem:[#allocation2 + $0x310] sm:$0xff] }
  0xad   :  { %967 = vmatprep.subr.bf16.mxu1 %v2151_v21  ;;  %v161_v21 = vld [vmem:[#allocation2 + $0x330] sm:$0xff] }
  0xae   :  { %v2239_v25 = vcombine.high %v157_v20, %v161_v21  ;;  %1942 = vmatpush1.bf16.msra.mxu0 %v2466_v23  ;;  %v2238_v29 = vcombine.low %v157_v20, %v161_v21  ;;  %v150_v20 = vld [vmem:[#allocation2 + $0x2d8] sm:$0xff] }
  0xaf   :  { %v154_v21 = vld [vmem:[#allocation2 + $0x2f8] sm:$0xff] }
  0xb0   :  { %968 = vmatpush1.bf16.msra.mxu1 %v2150_v27  ;;  %v169_v27 = vld [vmem:[#allocation2 + $0x370] sm:$0xff]  ;;  %v2233_v23 = vcombine.high %v150_v20, %v154_v21 }
  0xb1   :  { %969 = vmatprep.subr.bf16.mxu1 %v2159_v28  ;;  %v2469_v28 = vld [vmem:[#allocation5 + $0x104] ss:$8 sps:$4 sm:$0xff]   ;;  %v2247_v30 = vcombine.high %v165_v26, %v169_v27 }
  0xb2   :  { %1954 = vmatprep.subr.bf16.mxu0 %v2469_v28  ;;  %v166_v28 = vld [vmem:[#allocation2 + $0x358] sm:$0xff] }
  0xb4   :  { %970 = vmatpush1.bf16.msra.mxu1 %v2158_v33  ;;  %v2246_v33 = vcombine.low %v165_v26, %v169_v27  ;;  %v2232_v26 = vcombine.low %v150_v20, %v154_v21  ;;  %v2476_v20 = vld [vmem:[#allocation5 + $0x130] ss:$8 sps:$4 sm:$0xff]   ;;  %v2481_v21 = vld [vmem:[#allocation5 + $0x144] ss:$8 sps:$4 sm:$0xff]  }
  0xb5   :  { %971 = vmatprep.subr.bf16.mxu1 %v2167_v34  ;;  %v2255_v34 = vcombine.high %v173_v31, %v177_v32  ;;  %v174_v32 = vld [vmem:[#allocation2 + $0x398] sm:$0xff] }
  0xb8   :  { %972 = vmatpush1.bf16.msra.mxu1 %v2166_v39  ;;  %v62_v39 = vld [vmem:[#allocation2 + $0x18] sm:$0xff] }
  0xb9   :  { %973 = vmatprep.subr.bf16.mxu1 %v2175_v40  ;;  %v66_v40 = vld [vmem:[#allocation2 + $0x38] sm:$0xff] }
  0xba   :  { %v2145_v42 = vcombine.high %v62_v39, %v66_v40 }
  0xbc   :  { %974 = vmatpush1.bf16.msra.mxu1 %v2174_v45  ;;  %v2144_v45 = vcombine.low %v62_v39, %v66_v40 }
  0xbd   :  { %975 = vmatprep.subr.bf16.mxu1 %v2183_v46  ;;  %v2153_v46 = vcombine.high %v70_v43, %v74_v44  ;;  %v2802_v44 = vld [vmem:[%s2844_s2] sm:$0xff] }
  0xc0   :  { %976 = vmatpush1.bf16.msra.mxu1 %v2182_v50  ;;  %v2161_v50 = vcombine.high %v78_v47, %v82_v48 }
  0xc1   :  { %977 = vmatprep.subr.bf16.mxu1 %v2191_v51  ;;  %v86_v51 = vld [vmem:[#allocation2 + $0xd8] sm:$0xff] }
  0xc2   :  { %v2169_v54 = vcombine.high %v86_v51, %v90_v52 }
  0xc4   :  { %978 = vmatpush1.bf16.msra.mxu1 %v2190_v56  ;;  %v98_v56 = vld [vmem:[#allocation2 + $0x138] sm:$0xff] }
  0xc5   :  { %979 = vmatprep.subr.bf16.mxu1 %v2199_v57  ;;  %v2168_v57 = vcombine.low %v86_v51, %v90_v52  ;;  %v2177_v58 = vcombine.high %v94_v55, %v98_v56  ;;  %v2176_v61 = vcombine.low %v94_v55, %v98_v56 }
  0xc8   :  { %980 = vmatpush1.bf16.msra.mxu1 %v2198_v62  ;;  %v110_v62 = vld [vmem:[#allocation2 + $0x198] sm:$0xff] }
  0xc9   :  { %981 = vmatprep.subr.bf16.mxu1 %v2207_v63  ;;  %v114_v63 = vld [vmem:[#allocation2 + $0x1b8] sm:$0xff] }
  0xca   :  { %v2193_v1 = vcombine.high %v110_v62, %v114_v63 }
  0xcc   :  { %982 = vmatpush1.bf16.msra.mxu1 %v2206_v4  ;;  %v2192_v4 = vcombine.low %v110_v62, %v114_v63 }
  0xcd   :  { %983 = vmatprep.subr.bf16.mxu1 %v2215_v6  ;;  %v2201_v6 = vcombine.high %v118_v2, %v122_v3 }
  0xd0   :  { %984 = vmatpush1.bf16.msra.mxu1 %v2214_v11  ;;  %v134_v11 = vld [vmem:[#allocation2 + $0x258] sm:$0xff] }
  0xd1   :  { %985 = vmatprep.subr.bf16.mxu1 %v2223_v12  ;;  %v138_v12 = vld [vmem:[#allocation2 + $0x278] sm:$0xff] }
  0xd2   :  { %v2217_v14 = vcombine.high %v134_v11, %v138_v12 }
  0xd4   :  { %986 = vmatpush1.bf16.msra.mxu1 %v2222_v18  ;;  %v2216_v18 = vcombine.low %v134_v11, %v138_v12 }
  0xd5   :  { %987 = vmatprep.subr.bf16.mxu1 %v2231_v19  ;;  %v2225_v19 = vcombine.high %v142_v15, %v146_v16  ;;  %v2470_v15 = vld [vmem:[#allocation5 + $0x110] ss:$8 sps:$4 sm:$0xff]   ;;  %v2475_v16 = vld [vmem:[#allocation5 + $0x124] ss:$8 sps:$4 sm:$0xff]  }
  0xd8   :  { %988 = vmatpush1.bf16.msra.mxu1 %v2230_v24  ;;  %v158_v24 = vld [vmem:[#allocation2 + $0x318] sm:$0xff] }
  0xd9   :  { %989 = vmatprep.subr.bf16.mxu1 %v2239_v25  ;;  %v162_v25 = vld [vmem:[#allocation2 + $0x338] sm:$0xff] }
  0xda   :  { %v2241_v27 = vcombine.high %v158_v24, %v162_v25 }
  0xdc   :  { %990 = vmatpush1.bf16.msra.mxu1 %v2238_v29  ;;  %v170_v29 = vld [vmem:[#allocation2 + $0x378] sm:$0xff] }
  0xdd   :  { %991 = vmatprep.subr.bf16.mxu1 %v2247_v30  ;;  %v2240_v30 = vcombine.low %v158_v24, %v162_v25  ;;  %v2249_v31 = vcombine.high %v166_v28, %v170_v29  ;;  %v2482_v24 = vld [vmem:[#allocation5 + $0x150] ss:$8 sps:$4 sm:$0xff]   ;;  %v2487_v25 = vld [vmem:[#allocation5 + $0x164] ss:$8 sps:$4 sm:$0xff]  }
  0xe0   :  { %992 = vmatpush1.bf16.msra.mxu1 %v2246_v33  ;;  %v178_v33 = vld [vmem:[#allocation2 + $0x3b8] sm:$0xff] }
  0xe1   :  { %993 = vmatprep.subr.bf16.mxu1 %v2255_v34  ;;  %v2248_v34 = vcombine.low %v166_v28, %v170_v29  ;;  %v2257_v35 = vcombine.high %v174_v32, %v178_v33  ;;  %v2488_v28 = vld [vmem:[#allocation5 + $0x170] ss:$8 sps:$4 sm:$0xff]   ;;  %v2493_v29 = vld [vmem:[#allocation5 + $0x184] ss:$8 sps:$4 sm:$0xff]  }
  0xe4   :  { %994 = vmatpush1.bf16.msra.mxu1 %v2254_v37  ;;  %v186_v37 = vld [vmem:[#allocation2 + $0x3f8] sm:$0xff] }
  0xe5   :  { %995 = vmatprep.subr.bf16.mxu1 %v2263_v38  ;;  %v2256_v38 = vcombine.low %v174_v32, %v178_v33  ;;  %v2265_v39 = vcombine.high %v182_v36, %v186_v37  ;;  %v2264_v40 = vcombine.low %v182_v36, %v186_v37 }
  0xe8   :  { %996 = vmatpush1.bf16.msra.mxu1 %v2262_v41  ;;  %v189_v41 = vlaneseq }
  0xe9   :  { %1008 = vmatprep.subr.bf16.mxu1 %v2145_v42 }
  0xea   :  { %v2796_v42 = vshrl.u32 %v189_v41, 7 }
  0xeb   :  { %998 = vmatmul.mubr.bf16.vlgmr.msra.gmra.mrb[8].mxu1 %v2787_v5 }
  0xec   :  { %1009 = vmatpush1.bf16.msra.mxu1 %v2144_v45  ;;  %1040 = vmatprep.mubr.bf16.mxu1 %v2781_v17  ;;  %v2185_v17 = vcombine.high %v102_v59, %v106_v60  ;;  %v191_v43 = vsub.s32 0, %v2796_v42  ;;  %v195_v45 = vsub.s32 1, %v2796_v42  ;;  %v199_v32 = vsub.s32 2, %v2796_v42 }
  0xed   :  { %1010 = vmatprep.subr.bf16.mxu1 %v2153_v46  ;;  %v203_v33 = vsub.s32 3, %v2796_v42 }
  0xee   :  { %v192_v46 = vrot.slane %v2802_v44, %v191_v43  ;;  %v200_v36 = vrot.slane %v2802_v44, %v199_v32  ;;  %v2533_v32 = vld [vmem:[#allocation5 + $0x260] ss:$8 sps:$4 sm:$0xff]  }
  0xef   :  { %v204_v37 = vrot.slane %v2802_v44, %v203_v33  ;;  %v2538_v33 = vld [vmem:[#allocation5 + $0x274] ss:$8 sps:$4 sm:$0xff]  }
  0xf0   :  { %1011 = vmatpush1.bf16.msra.mxu1 %v2152_v49 }
  0xf1   :  { %1012 = vmatprep.subr.bf16.mxu1 %v2161_v50 }
  0xf4   :  { %1013 = vmatpush1.bf16.msra.mxu1 %v2160_v53 }
  0xf5   :  { %1014 = vmatprep.subr.bf16.mxu1 %v2169_v54 }
  0xf8   :  { %1015 = vmatpush1.bf16.msra.mxu1 %v2168_v57 }
  0xf9   :  { %1016 = vmatprep.subr.bf16.mxu1 %v2177_v58 }
  0xfc   :  { %1017 = vmatpush1.bf16.msra.mxu1 %v2176_v61 }
  0xfd   :  { %1018 = vmatprep.subr.bf16.mxu1 %v2185_v17 }
 0x100   :  { %1019 = vmatpush1.bf16.msra.mxu1 %v2184_v0 }
 0x101   :  { %1020 = vmatprep.subr.bf16.mxu1 %v2193_v1 }
 0x104   :  { %1021 = vmatpush1.bf16.msra.mxu1 %v2192_v4 }
 0x105   :  { %1022 = vmatprep.subr.bf16.mxu1 %v2201_v6 }
 0x108   :  { %1023 = vmatpush1.bf16.msra.mxu1 %v2200_v9 }
 0x109   :  { %1024 = vmatprep.subr.bf16.mxu1 %v2209_v10 }
 0x10c   :  { %1025 = vmatpush1.bf16.msra.mxu1 %v2208_v13  ;;  %v2467_v13 = vld [vmem:[#allocation5 + $0x100] ss:$8 sps:$4 sm:$0xff]  }
 0x10d   :  { %1026 = vmatprep.subr.bf16.mxu1 %v2217_v14  ;;  %v2472_v14 = vld [vmem:[#allocation5 + $0x114] ss:$8 sps:$4 sm:$0xff]  }
 0x110   :  { %1027 = vmatpush1.bf16.msra.mxu1 %v2216_v18  ;;  %v2473_v18 = vld [vmem:[#allocation5 + $0x120] ss:$8 sps:$4 sm:$0xff]  }
 0x111   :  { %1028 = vmatprep.subr.bf16.mxu1 %v2225_v19  ;;  %v2478_v19 = vld [vmem:[#allocation5 + $0x134] ss:$8 sps:$4 sm:$0xff]  }
 0x114   :  { %1029 = vmatpush1.bf16.msra.mxu1 %v2224_v22  ;;  %v2479_v22 = vld [vmem:[#allocation5 + $0x140] ss:$8 sps:$4 sm:$0xff]  }
 0x115   :  { %1030 = vmatprep.subr.bf16.mxu1 %v2233_v23  ;;  %v2484_v23 = vld [vmem:[#allocation5 + $0x154] ss:$8 sps:$4 sm:$0xff]  }
 0x118   :  { %1031 = vmatpush1.bf16.msra.mxu1 %v2232_v26  ;;  %v2485_v26 = vld [vmem:[#allocation5 + $0x160] ss:$8 sps:$4 sm:$0xff]  }
 0x119   :  { %1032 = vmatprep.subr.bf16.mxu1 %v2241_v27  ;;  %v2490_v27 = vld [vmem:[#allocation5 + $0x174] ss:$8 sps:$4 sm:$0xff]  }
 0x11c   :  { %1033 = vmatpush1.bf16.msra.mxu1 %v2240_v30  ;;  %v2491_v30 = vld [vmem:[#allocation5 + $0x180] ss:$8 sps:$4 sm:$0xff]  }
 0x11d   :  { %1034 = vmatprep.subr.bf16.mxu1 %v2249_v31  ;;  %v2496_v31 = vld [vmem:[#allocation5 + $0x194] ss:$8 sps:$4 sm:$0xff]  }
 0x120   :  { %1035 = vmatpush1.bf16.msra.mxu1 %v2248_v34  ;;  %v2494_v34 = vld [vmem:[#allocation5 + $0x190] ss:$8 sps:$4 sm:$0xff]  }
 0x121   :  { %1036 = vmatprep.subr.bf16.mxu1 %v2257_v35  ;;  %v2499_v35 = vld [vmem:[#allocation5 + $0x1a4] ss:$8 sps:$4 sm:$0xff]  }
 0x124   :  { %1037 = vmatpush1.bf16.msra.mxu1 %v2256_v38  ;;  %v2497_v38 = vld [vmem:[#allocation5 + $0x1a0] ss:$8 sps:$4 sm:$0xff]  }
 0x125   :  { %1038 = vmatprep.subr.bf16.mxu1 %v2265_v39 }
 0x128   :  { %1039 = vmatpush1.bf16.msra.mxu1 %v2264_v40  ;;  %v2502_v40 = vld [vmem:[#allocation5 + $0x1b4] ss:$8 sps:$4 sm:$0xff]  }
 0x12b   :  { %1041 = vmatmul.mubr.bf16.vlgmr.msra.gmra.mrb[12].mxu1 %v2787_v5  ;;  %v196_v5 = vrot.slane %v2802_v44, %v195_v45 }
 0x13e   :  { %v913_v47 = vpop.f32.mrb[0].mxu1 }
 0x13f   :  { %v914_v48 = vadd.f32 %v913_v47, %v192_v46  ;;  %v915_v49 = vpop.f32.mrb[1].mxu1 }
 0x140   :  { %v916_v50 = vadd.f32 %v915_v49, %v196_v5  ;;  %v917_v51 = vpop.f32.mrb[2].mxu1 }
 0x141   :  { %v1067_v52 = vmul.f32 0.70710677, %v914_v48  ;;  %v918_v53 = vadd.f32 %v917_v51, %v192_v46  ;;  %v919_v54 = vpop.f32.mrb[3].mxu1  ;;  %v1051_v0 = vmul.f32 0.5, %v914_v48  ;;  %v2500_v51 = vld [vmem:[#allocation5 + $0x1b0] ss:$8 sps:$4 sm:$0xff]  }
 0x142   :  { %v1068_v55 = vmul.f32 0.70710677, %v916_v50  ;;  %v920_v56 = vadd.f32 %v919_v54, %v196_v5  ;;  %v1052_v3 = vmul.f32 0.5, %v916_v50  ;;  %v2505_v54 = vld [vmem:[#allocation5 + $0x1c4] ss:$8 sps:$4 sm:$0xff]  }
 0x143   :  { %2611 = verf.f32 %v1067_v52  ;;  %v1075_v57 = vmul.f32 0.70710677, %v918_v53  ;;  %v1059_v1 = vmul.f32 0.5, %v918_v53 }
 0x144   :  { %2613 = verf.f32 %v1068_v55  ;;  %v1076_v58 = vmul.f32 0.70710677, %v920_v56  ;;  %v1060_v4 = vmul.f32 0.5, %v920_v56 }
 0x145   :  { %2615 = verf.f32 %v1075_v57  ;;  %v2503_v57 = vld [vmem:[#allocation5 + $0x1c0] ss:$8 sps:$4 sm:$0xff]  }
 0x146   :  { %2617 = verf.f32 %v1076_v58  ;;  %v2508_v58 = vld [vmem:[#allocation5 + $0x1d4] ss:$8 sps:$4 sm:$0xff]  }
 0x14d   :  { %v2612_v59 = vpop.eup %2611 }
 0x14e   :  { %v2614_v60 = vpop.eup %2613  ;;  %v1099_v61 = vadd.f32 1.0, %v2612_v59  ;;  %v2506_v59 = vld [vmem:[#allocation5 + $0x1d0] ss:$8 sps:$4 sm:$0xff]  }
 0x14f   :  { %v2616_v17 = vpop.eup %2615  ;;  %v1100_v62 = vadd.f32 1.0, %v2614_v60  ;;  %v2511_v60 = vld [vmem:[#allocation5 + $0x1e4] ss:$8 sps:$4 sm:$0xff]  }
 0x150   :  { %v2618_v63 = vpop.eup %2617  ;;  %v1107_v2 = vadd.f32 1.0, %v2616_v17  ;;  %v1115_v7 = vmul.f32 %v1099_v61, %v1051_v0  ;;  %v2509_v17 = vld [vmem:[#allocation5 + $0x1e0] ss:$8 sps:$4 sm:$0xff]   ;;  %v2514_v0 = vld [vmem:[#allocation5 + $0x1f4] ss:$8 sps:$4 sm:$0xff]  }
 0x151   :  { %v1108_v6 = vadd.f32 1.0, %v2618_v63  ;;  %v1116_v9 = vmul.f32 %v1100_v62, %v1052_v3 }
 0x152   :  { %v1123_v8 = vmul.f32 %v1107_v2, %v1059_v1 }
 0x153   :  { %v1124_v10 = vmul.f32 %v1108_v6, %v1060_v4 }
 0x154   :  { %v1135_v11 = vpack.c.bf16 %v1123_v8, %v1115_v7 }
 0x155   :  { %v1136_v12 = vpack.c.bf16 %v1124_v10, %v1116_v9 }
 0x157   :  { %1943 = vmatprep.mubr.bf16.mxu0 %v1136_v12 }
 0x158   :  { %1944 = vmatmul.mubr.bf16.vlgmr.msra.gmra.mrb[0].mxu0 %v1135_v11  ;;  %v2512_v11 = vld [vmem:[#allocation5 + $0x1f0] ss:$8 sps:$4 sm:$0xff]  }
 0x159   :  { %1955 = vmatpush1.bf16.msra.mxu0 %v2467_v13 }
 0x15a   :  { %1956 = vmatprep.subr.bf16.mxu0 %v2472_v14  ;;  %v2517_v14 = vld [vmem:[#allocation5 + $0x204] ss:$8 sps:$4 sm:$0xff]  }
 0x15d   :  { %1957 = vmatpush1.bf16.msra.mxu0 %v2470_v15 }
 0x15e   :  { %1958 = vmatprep.subr.bf16.mxu0 %v2475_v16 }
 0x161   :  { %1959 = vmatpush1.bf16.msra.mxu0 %v2473_v18 }
 0x162   :  { %1960 = vmatprep.subr.bf16.mxu0 %v2478_v19 }
 0x165   :  { %1961 = vmatpush1.bf16.msra.mxu0 %v2476_v20  ;;  %v2515_v20 = vld [vmem:[#allocation5 + $0x200] ss:$8 sps:$4 sm:$0xff]  }
 0x166   :  { %1962 = vmatprep.subr.bf16.mxu0 %v2481_v21  ;;  %v2520_v21 = vld [vmem:[#allocation5 + $0x214] ss:$8 sps:$4 sm:$0xff]  }
 0x169   :  { %1963 = vmatpush1.bf16.msra.mxu0 %v2479_v22  ;;  %v2518_v22 = vld [vmem:[#allocation5 + $0x210] ss:$8 sps:$4 sm:$0xff]  }
 0x16a   :  { %1964 = vmatprep.subr.bf16.mxu0 %v2484_v23  ;;  %v2523_v23 = vld [vmem:[#allocation5 + $0x224] ss:$8 sps:$4 sm:$0xff]  }
 0x16d   :  { %1965 = vmatpush1.bf16.msra.mxu0 %v2482_v24  ;;  %v2521_v24 = vld [vmem:[#allocation5 + $0x220] ss:$8 sps:$4 sm:$0xff]  }
 0x16e   :  { %1966 = vmatprep.subr.bf16.mxu0 %v2487_v25  ;;  %v2526_v25 = vld [vmem:[#allocation5 + $0x234] ss:$8 sps:$4 sm:$0xff]  }
 0x171   :  { %1967 = vmatpush1.bf16.msra.mxu0 %v2485_v26  ;;  %v2524_v26 = vld [vmem:[#allocation5 + $0x230] ss:$8 sps:$4 sm:$0xff]  }
 0x172   :  { %1968 = vmatprep.subr.bf16.mxu0 %v2490_v27  ;;  %v2529_v27 = vld [vmem:[#allocation5 + $0x244] ss:$8 sps:$4 sm:$0xff]  }
 0x175   :  { %1969 = vmatpush1.bf16.msra.mxu0 %v2488_v28  ;;  %v2527_v28 = vld [vmem:[#allocation5 + $0x240] ss:$8 sps:$4 sm:$0xff]  }
 0x176   :  { %1970 = vmatprep.subr.bf16.mxu0 %v2493_v29  ;;  %v2532_v29 = vld [vmem:[#allocation5 + $0x254] ss:$8 sps:$4 sm:$0xff]  }
 0x179   :  { %1971 = vmatpush1.bf16.msra.mxu0 %v2491_v30  ;;  %v2530_v30 = vld [vmem:[#allocation5 + $0x250] ss:$8 sps:$4 sm:$0xff]  }
 0x17a   :  { %1972 = vmatprep.subr.bf16.mxu0 %v2496_v31  ;;  %v2535_v31 = vld [vmem:[#allocation5 + $0x264] ss:$8 sps:$4 sm:$0xff]  }
 0x17d   :  { %1973 = vmatpush1.bf16.msra.mxu0 %v2494_v34  ;;  %v2536_v34 = vld [vmem:[#allocation5 + $0x270] ss:$8 sps:$4 sm:$0xff]  }
 0x17e   :  { %v956_v39 = vpop.f32.mrb[4].mxu1  ;;  %1974 = vmatprep.subr.bf16.mxu0 %v2499_v35  ;;  %v2541_v35 = vld [vmem:[#allocation5 + $0x284] ss:$8 sps:$4 sm:$0xff]  }
 0x17f   :  { %v957_v41 = vadd.f32 %v956_v39, %v200_v36  ;;  %v958_v46 = vpop.f32.mrb[5].mxu1  ;;  %v211_v39 = vsub.s32 5, %v2796_v42 }
 0x180   :  { %v959_v5 = vadd.f32 %v958_v46, %v204_v37  ;;  %v960_v47 = vpop.f32.mrb[6].mxu1 }
 0x181   :  { %v1069_v48 = vmul.f32 0.70710677, %v957_v41  ;;  %v961_v49 = vadd.f32 %v960_v47, %v200_v36  ;;  %v962_v50 = vpop.f32.mrb[7].mxu1  ;;  %1975 = vmatpush1.bf16.msra.mxu0 %v2497_v38  ;;  %v1053_v4 = vmul.f32 0.5, %v957_v41  ;;  %v2539_v36 = vld [vmem:[#allocation5 + $0x280] ss:$8 sps:$4 sm:$0xff]  }
 0x182   :  { %v1070_v52 = vmul.f32 0.70710677, %v959_v5  ;;  %v963_v53 = vadd.f32 %v962_v50, %v204_v37  ;;  %1976 = vmatprep.subr.bf16.mxu0 %v2502_v40  ;;  %v1054_v8 = vmul.f32 0.5, %v959_v5  ;;  %v2544_v37 = vld [vmem:[#allocation5 + $0x294] ss:$8 sps:$4 sm:$0xff]   ;;  %v207_v38 = vsub.s32 4, %v2796_v42 }
 0x183   :  { %2619 = verf.f32 %v1069_v48  ;;  %v1077_v55 = vmul.f32 0.70710677, %v961_v49  ;;  %v1061_v6 = vmul.f32 0.5, %v961_v49  ;;  %v2542_v40 = vld [vmem:[#allocation5 + $0x290] ss:$8 sps:$4 sm:$0xff]   ;;  %v212_v5 = vrot.slane %v2802_v44, %v211_v39 }
 0x184   :  { %2621 = verf.f32 %v1070_v52  ;;  %v1078_v56 = vmul.f32 0.70710677, %v963_v53  ;;  %v1062_v9 = vmul.f32 0.5, %v963_v53  ;;  %v2547_v41 = vld [vmem:[#allocation5 + $0x2a4] ss:$8 sps:$4 sm:$0xff]   ;;  %v208_v46 = vrot.slane %v2802_v44, %v207_v38 }
 0x185   :  { %2623 = verf.f32 %v1077_v55  ;;  %1977 = vmatpush1.bf16.msra.mxu0 %v2500_v51  ;;  %v2545_v47 = vld [vmem:[#allocation5 + $0x2a0] ss:$8 sps:$4 sm:$0xff]   ;;  %v2550_v49 = vld [vmem:[#allocation5 + $0x2b4] ss:$8 sps:$4 sm:$0xff]  }
 0x186   :  { %2625 = verf.f32 %v1078_v56  ;;  %1978 = vmatprep.subr.bf16.mxu0 %v2505_v54  ;;  %v2581_v38 = vld [vmem:[#allocation5 + $0x360] ss:$8 sps:$4 sm:$0xff]   ;;  %v2586_v39 = vld [vmem:[#allocation5 + $0x374] ss:$8 sps:$4 sm:$0xff]  }
 0x189   :  { %1979 = vmatpush1.bf16.msra.mxu0 %v2503_v57  ;;  %v2548_v57 = vld [vmem:[#allocation5 + $0x2b0] ss:$8 sps:$4 sm:$0xff]  }
 0x18a   :  { %1980 = vmatprep.subr.bf16.mxu0 %v2508_v58 }
 0x18d   :  { %v2620_v61 = vpop.eup %2619  ;;  %1981 = vmatpush1.bf16.msra.mxu0 %v2506_v59 }
 0x18e   :  { %v2622_v62 = vpop.eup %2621  ;;  %v1101_v63 = vadd.f32 1.0, %v2620_v61  ;;  %1982 = vmatprep.subr.bf16.mxu0 %v2511_v60  ;;  %v2553_v60 = vld [vmem:[#allocation5 + $0x2c4] ss:$8 sps:$4 sm:$0xff]  }
 0x18f   :  { %v2624_v1 = vpop.eup %2623  ;;  %v1102_v2 = vadd.f32 1.0, %v2622_v62  ;;  %v2551_v62 = vld [vmem:[#allocation5 + $0x2c0] ss:$8 sps:$4 sm:$0xff]  }
 0x190   :  { %v2626_v3 = vpop.eup %2625  ;;  %v1109_v7 = vadd.f32 1.0, %v2624_v1  ;;  %v1117_v12 = vmul.f32 %v1101_v63, %v1053_v4  ;;  %v2556_v63 = vld [vmem:[#allocation5 + $0x2d4] ss:$8 sps:$4 sm:$0xff]   ;;  %v2559_v1 = vld [vmem:[#allocation5 + $0x2e4] ss:$8 sps:$4 sm:$0xff]  }
 0x191   :  { %v1110_v10 = vadd.f32 1.0, %v2626_v3  ;;  %1983 = vmatpush1.bf16.msra.mxu0 %v2509_v17  ;;  %v1118_v15 = vmul.f32 %v1102_v2, %v1054_v8  ;;  %v2557_v3 = vld [vmem:[#allocation5 + $0x2e0] ss:$8 sps:$4 sm:$0xff]  }
 0x192   :  { %v1125_v13 = vmul.f32 %v1109_v7, %v1061_v6  ;;  %1984 = vmatprep.subr.bf16.mxu0 %v2514_v0  ;;  %v2554_v0 = vld [vmem:[#allocation5 + $0x2d0] ss:$8 sps:$4 sm:$0xff]   ;;  %v2562_v7 = vld [vmem:[#allocation5 + $0x2f4] ss:$8 sps:$4 sm:$0xff]  }
 0x193   :  { %v1126_v16 = vmul.f32 %v1110_v10, %v1062_v9 }
 0x194   :  { %v1137_v18 = vpack.c.bf16 %v1125_v13, %v1117_v12 }
 0x195   :  { %1985 = vmatpush1.bf16.msra.mxu0 %v2512_v11  ;;  %v1138_v19 = vpack.c.bf16 %v1126_v16, %v1118_v15 }
 0x196   :  { %1997 = vmatprep.subr.bf16.mxu0 %v2517_v14 }
 0x197   :  { %1986 = vmatprep.mubr.bf16.mxu0 %v1138_v19 }
 0x198   :  { %1987 = vmatmul.mubr.bf16.vlgmr.msra.gmra.mrb[0].mxu0 %v1137_v18  ;;  %v2560_v18 = vld [vmem:[#allocation5 + $0x2f0] ss:$8 sps:$4 sm:$0xff]  }
 0x199   :  { %1998 = vmatpush1.bf16.msra.mxu0 %v2515_v20 }
 0x19a   :  { %1999 = vmatprep.subr.bf16.mxu0 %v2520_v21  ;;  %v2565_v21 = vld [vmem:[#allocation5 + $0x304] ss:$8 sps:$4 sm:$0xff]  }
 0x19d   :  { %2000 = vmatpush1.bf16.msra.mxu0 %v2518_v22 }
 0x19e   :  { %2001 = vmatprep.subr.bf16.mxu0 %v2523_v23 }
 0x1a1   :  { %2002 = vmatpush1.bf16.msra.mxu0 %v2521_v24 }
 0x1a2   :  { %2003 = vmatprep.subr.bf16.mxu0 %v2526_v25 }
 0x1a5   :  { %2004 = vmatpush1.bf16.msra.mxu0 %v2524_v26  ;;  %v2563_v26 = vld [vmem:[#allocation5 + $0x300] ss:$8 sps:$4 sm:$0xff]  }
 0x1a6   :  { %2005 = vmatprep.subr.bf16.mxu0 %v2529_v27  ;;  %v2568_v27 = vld [vmem:[#allocation5 + $0x314] ss:$8 sps:$4 sm:$0xff]  }
 0x1a9   :  { %2006 = vmatpush1.bf16.msra.mxu0 %v2527_v28  ;;  %v2566_v28 = vld [vmem:[#allocation5 + $0x310] ss:$8 sps:$4 sm:$0xff]  }
 0x1aa   :  { %2007 = vmatprep.subr.bf16.mxu0 %v2532_v29  ;;  %v2571_v29 = vld [vmem:[#allocation5 + $0x324] ss:$8 sps:$4 sm:$0xff]  }
 0x1ad   :  { %2008 = vmatpush1.bf16.msra.mxu0 %v2530_v30  ;;  %v2569_v30 = vld [vmem:[#allocation5 + $0x320] ss:$8 sps:$4 sm:$0xff]  }
 0x1ae   :  { %2009 = vmatprep.subr.bf16.mxu0 %v2535_v31  ;;  %v2574_v31 = vld [vmem:[#allocation5 + $0x334] ss:$8 sps:$4 sm:$0xff]  }
 0x1b1   :  { %2010 = vmatpush1.bf16.msra.mxu0 %v2533_v32  ;;  %v2572_v32 = vld [vmem:[#allocation5 + $0x330] ss:$8 sps:$4 sm:$0xff]  }
 0x1b2   :  { %2011 = vmatprep.subr.bf16.mxu0 %v2538_v33  ;;  %v2577_v33 = vld [vmem:[#allocation5 + $0x344] ss:$8 sps:$4 sm:$0xff]  }
 0x1b5   :  { %2012 = vmatpush1.bf16.msra.mxu0 %v2536_v34  ;;  %v2575_v34 = vld [vmem:[#allocation5 + $0x340] ss:$8 sps:$4 sm:$0xff]  }
 0x1b6   :  { %2013 = vmatprep.subr.bf16.mxu0 %v2541_v35  ;;  %v2580_v35 = vld [vmem:[#allocation5 + $0x354] ss:$8 sps:$4 sm:$0xff]  }
 0x1b9   :  { %2014 = vmatpush1.bf16.msra.mxu0 %v2539_v36  ;;  %v2578_v36 = vld [vmem:[#allocation5 + $0x350] ss:$8 sps:$4 sm:$0xff]  }
 0x1ba   :  { %2015 = vmatprep.subr.bf16.mxu0 %v2544_v37  ;;  %v2583_v37 = vld [vmem:[#allocation5 + $0x364] ss:$8 sps:$4 sm:$0xff]  }
 0x1bd   :  { %2016 = vmatpush1.bf16.msra.mxu0 %v2542_v40  ;;  %v2584_v40 = vld [vmem:[#allocation5 + $0x370] ss:$8 sps:$4 sm:$0xff]  }
 0x1be   :  { %v999_v48 = vpop.f32.mrb[8].mxu1  ;;  %2017 = vmatprep.subr.bf16.mxu0 %v2547_v41  ;;  %v2589_v41 = vld [vmem:[#allocation5 + $0x384] ss:$8 sps:$4 sm:$0xff]  }
 0x1bf   :  { %v1000_v50 = vadd.f32 %v999_v48, %v208_v46  ;;  %v1001_v51 = vpop.f32.mrb[9].mxu1  ;;  %v219_v48 = vsub.s32 7, %v2796_v42 }
 0x1c0   :  { %v1002_v52 = vadd.f32 %v1001_v51, %v212_v5  ;;  %v1003_v53 = vpop.f32.mrb[10].mxu1 }
 0x1c1   :  { %v1071_v54 = vmul.f32 0.70710677, %v1000_v50  ;;  %v1004_v55 = vadd.f32 %v1003_v53, %v208_v46  ;;  %v1005_v56 = vpop.f32.mrb[11].mxu1  ;;  %2018 = vmatpush1.bf16.msra.mxu0 %v2545_v47  ;;  %v1055_v11 = vmul.f32 0.5, %v1000_v50  ;;  %v2587_v46 = vld [vmem:[#allocation5 + $0x380] ss:$8 sps:$4 sm:$0xff]  }
 0x1c2   :  { %v1072_v58 = vmul.f32 0.70710677, %v1002_v52  ;;  %v1006_v59 = vadd.f32 %v1005_v56, %v212_v5  ;;  %2019 = vmatprep.subr.bf16.mxu0 %v2550_v49  ;;  %v1056_v14 = vmul.f32 0.5, %v1002_v52  ;;  %v2592_v5 = vld [vmem:[#allocation5 + $0x394] ss:$8 sps:$4 sm:$0xff]   ;;  %v215_v47 = vsub.s32 6, %v2796_v42 }
 0x1c3   :  { %2627 = verf.f32 %v1071_v54  ;;  %v1079_v61 = vmul.f32 0.70710677, %v1004_v55  ;;  %v1063_v12 = vmul.f32 0.5, %v1004_v55  ;;  %v2590_v49 = vld [vmem:[#allocation5 + $0x390] ss:$8 sps:$4 sm:$0xff]   ;;  %v220_v52 = vrot.slane %v2802_v44, %v219_v48 }
 0x1c4   :  { %2629 = verf.f32 %v1072_v58  ;;  %v1080_v17 = vmul.f32 0.70710677, %v1006_v59  ;;  %v1064_v15 = vmul.f32 0.5, %v1006_v59  ;;  %v2595_v50 = vld [vmem:[#allocation5 + $0x3a4] ss:$8 sps:$4 sm:$0xff]   ;;  %v216_v51 = vrot.slane %v2802_v44, %v215_v47 }
 0x1c5   :  { %2631 = verf.f32 %v1079_v61  ;;  %2020 = vmatpush1.bf16.msra.mxu0 %v2548_v57  ;;  %v2593_v53 = vld [vmem:[#allocation5 + $0x3a0] ss:$8 sps:$4 sm:$0xff]   ;;  %v2598_v55 = vld [vmem:[#allocation5 + $0x3b4] ss:$8 sps:$4 sm:$0xff]  }
 0x1c6   :  { %2633 = verf.f32 %v1080_v17  ;;  %2021 = vmatprep.subr.bf16.mxu0 %v2553_v60 }
 0x1c9   :  { %2022 = vmatpush1.bf16.msra.mxu0 %v2551_v62  ;;  %v2596_v62 = vld [vmem:[#allocation5 + $0x3b0] ss:$8 sps:$4 sm:$0xff]  }
 0x1ca   :  { %2023 = vmatprep.subr.bf16.mxu0 %v2556_v63 }
 0x1cd   :  { %v2628_v2 = vpop.eup %2627  ;;  %2024 = vmatpush1.bf16.msra.mxu0 %v2554_v0 }
 0x1ce   :  { %v2630_v4 = vpop.eup %2629  ;;  %v1103_v6 = vadd.f32 1.0, %v2628_v2  ;;  %2025 = vmatprep.subr.bf16.mxu0 %v2559_v1  ;;  %v2601_v1 = vld [vmem:[#allocation5 + $0x3c4] ss:$8 sps:$4 sm:$0xff]  }
 0x1cf   :  { %v2632_v8 = vpop.eup %2631  ;;  %v1104_v9 = vadd.f32 1.0, %v2630_v4  ;;  %v2604_v4 = vld [vmem:[#allocation5 + $0x3d4] ss:$8 sps:$4 sm:$0xff]  }
 0x1d0   :  { %v2634_v10 = vpop.eup %2633  ;;  %v1111_v13 = vadd.f32 1.0, %v2632_v8  ;;  %v1119_v19 = vmul.f32 %v1103_v6, %v1055_v11  ;;  %v2602_v6 = vld [vmem:[#allocation5 + $0x3d0] ss:$8 sps:$4 sm:$0xff]  }
 0x1d1   :  { %v1112_v16 = vadd.f32 1.0, %v2634_v10  ;;  %2026 = vmatpush1.bf16.msra.mxu0 %v2557_v3  ;;  %v1120_v22 = vmul.f32 %v1104_v9, %v1056_v14  ;;  %v2599_v3 = vld [vmem:[#allocation5 + $0x3c0] ss:$8 sps:$4 sm:$0xff]  }
 0x1d2   :  { %v1127_v20 = vmul.f32 %v1111_v13, %v1063_v12  ;;  %2027 = vmatprep.subr.bf16.mxu0 %v2562_v7  ;;  %v2607_v7 = vld [vmem:[#allocation5 + $0x3e4] ss:$8 sps:$4 sm:$0xff]   ;;  %v2605_v9 = vld [vmem:[#allocation5 + $0x3e0] ss:$8 sps:$4 sm:$0xff]   ;;  %v2610_v12 = vld [vmem:[#allocation5 + $0x3f4] ss:$8 sps:$4 sm:$0xff]  }
 0x1d3   :  { %v1128_v23 = vmul.f32 %v1112_v16, %v1064_v15 }
 0x1d4   :  { %v1139_v24 = vpack.c.bf16 %v1127_v20, %v1119_v19 }
 0x1d5   :  { %2028 = vmatpush1.bf16.msra.mxu0 %v2560_v18  ;;  %v1140_v25 = vpack.c.bf16 %v1128_v23, %v1120_v22  ;;  %v2608_v23 = vld [vmem:[#allocation5 + $0x3f0] ss:$8 sps:$4 sm:$0xff]  }
 0x1d6   :  { %2040 = vmatprep.subr.bf16.mxu0 %v2565_v21 }
 0x1d7   :  { %2029 = vmatprep.mubr.bf16.mxu0 %v1140_v25 }
 0x1d8   :  { %2030 = vmatmul.mubr.bf16.vlgmr.msra.gmra.mrb[0].mxu0 %v1139_v24 }
 0x1d9   :  { %2041 = vmatpush1.bf16.msra.mxu0 %v2563_v26 }
 0x1da   :  { %2042 = vmatprep.subr.bf16.mxu0 %v2568_v27 }
 0x1dd   :  { %2043 = vmatpush1.bf16.msra.mxu0 %v2566_v28 }
 0x1de   :  { %2044 = vmatprep.subr.bf16.mxu0 %v2571_v29 }
 0x1e1   :  { %2045 = vmatpush1.bf16.msra.mxu0 %v2569_v30  ;;  %v2098_v30 = vld [vmem:[%s2846_s4] sm:$0x3]  ;;  %s2687_s4 = scalar_lea.vmem %s2124_s26, 512 }
 0x1e2   :  { %2046 = vmatprep.subr.bf16.mxu0 %v2574_v31  ;;  %v2103_v31 = vrot.slane %v2098_v30, %v191_v43  ;;  %p2688_p2 = scmp.ne.s32.totalorder %s2124_s26, %s2687_s4  ;;  %p2693_p4 = scmp.lt.s32.totalorder %s2687_s4, %s2687_s4 }
 0x1e4   :  { %p2694_p5 = por %p2693_p4, %p2692_p3 }
 0x1e5   :  { %2047 = vmatpush1.bf16.msra.mxu0 %v2572_v32  ;;  %v2107_v32 = vrot.slane %v2098_v30, %v195_v45 }
 0x1e6   :  { %2048 = vmatprep.subr.bf16.mxu0 %v2577_v33  ;;  %p2695_p6 = pnand %p2694_p5, %p2688_p2 }
 0x1e9   :  { %2049 = vmatpush1.bf16.msra.mxu0 %v2575_v34 }
 0x1ea   :  { %2050 = vmatprep.subr.bf16.mxu0 %v2580_v35 }
 0x1ed   :  { %2051 = vmatpush1.bf16.msra.mxu0 %v2578_v36 }
 0x1ee   :  { %2052 = vmatprep.subr.bf16.mxu0 %v2583_v37 }
 0x1f1   :  { %2053 = vmatpush1.bf16.msra.mxu0 %v2581_v38 }
 0x1f2   :  { %2054 = vmatprep.subr.bf16.mxu0 %v2586_v39 }
 0x1f5   :  { %2055 = vmatpush1.bf16.msra.mxu0 %v2584_v40 }
 0x1f6   :  { %2056 = vmatprep.subr.bf16.mxu0 %v2589_v41 }
 0x1f9   :  { %2057 = vmatpush1.bf16.msra.mxu0 %v2587_v46 }
 0x1fa   :  { %2058 = vmatprep.subr.bf16.mxu0 %v2592_v5 }
 0x1fd   :  { %2059 = vmatpush1.bf16.msra.mxu0 %v2590_v49 }
 0x1fe   :  { %v1042_v54 = vpop.f32.mrb[12].mxu1  ;;  %2060 = vmatprep.subr.bf16.mxu0 %v2595_v50 }
 0x1ff   :  { %v1043_v56 = vadd.f32 %v1042_v54, %v216_v51  ;;  %v1044_v57 = vpop.f32.mrb[13].mxu1 }
 0x200   :  { %v1045_v58 = vadd.f32 %v1044_v57, %v220_v52  ;;  %v1046_v59 = vpop.f32.mrb[14].mxu1 }
 0x201   :  { %v1073_v60 = vmul.f32 0.70710677, %v1043_v56  ;;  %v1047_v61 = vadd.f32 %v1046_v59, %v216_v51  ;;  %v1048_v17 = vpop.f32.mrb[15].mxu1  ;;  %2061 = vmatpush1.bf16.msra.mxu0 %v2593_v53  ;;  %v1057_v16 = vmul.f32 0.5, %v1043_v56 }
 0x202   :  { %v1074_v63 = vmul.f32 0.70710677, %v1045_v58  ;;  %v1049_v0 = vadd.f32 %v1048_v17, %v220_v52  ;;  %2062 = vmatprep.subr.bf16.mxu0 %v2598_v55  ;;  %v1058_v20 = vmul.f32 0.5, %v1045_v58 }
 0x203   :  { %2635 = verf.f32 %v1073_v60  ;;  %v1081_v44 = vmul.f32 0.70710677, %v1047_v61  ;;  %v1065_v18 = vmul.f32 0.5, %v1047_v61 }
 0x204   :  { %2637 = verf.f32 %v1074_v63  ;;  %v1082_v2 = vmul.f32 0.70710677, %v1049_v0  ;;  %v1066_v21 = vmul.f32 0.5, %v1049_v0 }
 0x205   :  { %2639 = verf.f32 %v1081_v44  ;;  %2063 = vmatpush1.bf16.msra.mxu0 %v2596_v62 }
 0x206   :  { %2641 = verf.f32 %v1082_v2  ;;  %2064 = vmatprep.subr.bf16.mxu0 %v2601_v1 }
 0x209   :  { %2065 = vmatpush1.bf16.msra.mxu0 %v2599_v3 }
 0x20a   :  { %2066 = vmatprep.subr.bf16.mxu0 %v2604_v4 }
 0x20d   :  { %v2636_v8 = vpop.eup %2635  ;;  %2067 = vmatpush1.bf16.msra.mxu0 %v2602_v6 }
 0x20e   :  { %v2638_v10 = vpop.eup %2637  ;;  %v1105_v11 = vadd.f32 1.0, %v2636_v8  ;;  %2068 = vmatprep.subr.bf16.mxu0 %v2607_v7 }
 0x20f   :  { %v2640_v13 = vpop.eup %2639  ;;  %v1106_v14 = vadd.f32 1.0, %v2638_v10 }
 0x210   :  { %v2642_v15 = vpop.eup %2641  ;;  %v1113_v19 = vadd.f32 1.0, %v2640_v13  ;;  %v1121_v24 = vmul.f32 %v1105_v11, %v1057_v16 }
 0x211   :  { %v1114_v22 = vadd.f32 1.0, %v2642_v15  ;;  %2069 = vmatpush1.bf16.msra.mxu0 %v2605_v9  ;;  %v1122_v26 = vmul.f32 %v1106_v14, %v1058_v20 }
 0x212   :  { %v1129_v25 = vmul.f32 %v1113_v19, %v1065_v18  ;;  %2070 = vmatprep.subr.bf16.mxu0 %v2610_v12 }
 0x213   :  { %v1130_v27 = vmul.f32 %v1114_v22, %v1066_v21 }
 0x214   :  { %v1141_v28 = vpack.c.bf16 %v1129_v25, %v1121_v24 }
 0x215   :  { %2071 = vmatpush1.bf16.msra.mxu0 %v2608_v23  ;;  %v1142_v29 = vpack.c.bf16 %v1130_v27, %v1122_v26 }
 0x217   :  { %2072 = vmatprep.mubr.bf16.mxu0 %v1142_v29 }
 0x218   :  { %2073 = vmatmul.mubr.bf16.vlgmr.msra.gmra.mrb[0].mxu0 %v1141_v28 }
 0x2eb   :  { %v2074_v33 = vpop.f32.mrb[0].mxu0 }
 0x2ec   :  { %v2076_v34 = vpop.f32.mrb[1].mxu0  ;;  %v2110_v36 = vadd.f32 %v2103_v31, %v2074_v33 }
 0x2ed   :  { %v2078_v35 = vpop.f32.mrb[2].mxu0  ;;  %v2111_v38 = vadd.f32 %v2107_v32, %v2076_v34 }
 0x2ee   :  { %v2080_v37 = vpop.f32.mrb[3].mxu0  ;;  %2114 = vst [vmem:[#allocation7] sm:$0xff] %v2110_v36  ;;  %v2112_v39 = vadd.f32 %v2103_v31, %v2078_v35 }
 0x2ef   :  { %2115 = vst [vmem:[#allocation7 + $0x8] sm:$0xff] %v2111_v38  ;;  %v2113_v40 = vadd.f32 %v2107_v32, %v2080_v37 }
 0x2f0   :  { %2116 = vst [vmem:[#allocation7 + $0x10] sm:$0xff] %v2112_v39 }
 0x2f1   :  { %2117 = vst [vmem:[#allocation7 + $0x18] sm:$0xff] %v2113_v40 }
 0x2f2   :  { %2698 = shalt.err (!%p2695_p6)
}
 0x2f3   :  { %s2699_s29 = scalar_lea.hbm %s2847_s5, 512 }
 0x2f4   :  { %p2700_p7 = scmp.ne.s32.totalorder %s2847_s5, %s2699_s29  ;;  %p2703_p8 = scmp.lt.u32.totalorder %s2699_s29, %s2847_s5 }
 0x2f6   :  { %p2705_p9 = pnand %p2703_p8, %p2700_p7 }
 0x2f8   :  { %2708 = shalt.err (!%p2705_p9)
}
 0x2f9   :  { %s2722_s9 = smov 256   ;;  %s2723_s10 = smov 16  }
 0x2fa   :  { %2129 = dma.vmem_to_hbm [thread:$0]  %s2124_s26, 512, %s2847_s5, [#allocation4], %s2722_s9, %s2722_s9, %s2723_s10  }
 0x2fb   :  { %2713 = dma.done.wait [#allocation4], 512  }
 0x2fc   :  { %2714 = vsyncadd [#allocation4], 4294966784 }
 0x2fd   :  { %2133 = vsyncpa [#allocation3], 1 }
 0x2fe   :  { %2134 = vsyncpa [#allocation6], 1 }
 0x2ff   :  { %2135 = vsyncpa [#allocation4], 1 }

</bundles_post_ra>
